<compile_context>
chip_gen: v7x
topology: tpu7x:2x2x1
jax: 0.10.0
libtpu: 0.0.40
codegen_flags: <defaults>
</compile_context>

<pallas_src>
from functools import partial

import jax
import jax.numpy as jnp
from jax import lax
from jax.experimental import pallas as pl
from jax.experimental.pallas import tpu as pltpu

ALPHA = 0.3
BETA = 0.1


def _log_softmax(x):
    m = jnp.max(x, axis=-1, keepdims=True)
    z = x - m
    return z - jnp.log(jnp.sum(jnp.exp(z), axis=-1, keepdims=True))


def mvd_loss_kernel(men_ref, ent_ref, pool_ref, w_ref, b_ref, lab_ref, out_ref,
                    *, B, C, V):
    TB, CV, H = ent_ref.shape
    mf = men_ref[...].astype(jnp.float32)            # (TB, H)   mention embedding tile
    wf = w_ref[...].astype(jnp.float32)              # (1, H)    teacher scoring weight
    bt = b_ref[0, 0]                                 # f32 scalar (SMEM) teacher bias
    lab = lab_ref[...]                               # (TB, C)   f32 one-hot labels

    ef = ent_ref[...].astype(jnp.float32)            # (TB, CV, H) entity view embeddings
    pf = pool_ref[...].astype(jnp.float32)           # (TB, CV, H) teacher pooled features

    # ---- scoring: VPU broadcast-multiply + lane reduce (f32 accumulation).
    # retrieval[b,cv] = <ent_emb[b,cv,:], mention_emb[b,:]>
    # teacher[b,cv]   = <pooled[b,cv,:], w> + bias
    r = jnp.sum(ef * mf[:, None, :], axis=-1)                    # (TB, CV)
    t = jnp.sum(pf * wf[None, :, :], axis=-1) + bt               # (TB, CV)

    # small f32 reshape only (the big bf16 tiles are never retiled in-kernel)
    r3 = r.reshape(TB, C, V)
    t3 = t.reshape(TB, C, V)

    # ---- view aggregation ----
    t_max = jnp.max(t3, axis=-1)                     # (TB, C) teacher_logits_origin
    r_max = jnp.max(r3, axis=-1)                     # (TB, C) retrieval_logits_origin

    # retrieval logit at the teacher's argmax view (first-max, like torch.argmax)
    iota = lax.broadcasted_iota(jnp.int32, (TB, C, V), 2)
    is_max = t3 == t_max[..., None]
    first = jnp.min(jnp.where(is_max, iota, V), axis=-1, keepdims=True)
    r_aligned = jnp.sum(jnp.where(iota == first, r3, 0.0), axis=-1)   # (TB, C)

    # ---- per-tile raw loss sums; denominators are *global* constants, so
    #      summing the per-tile partials outside reproduces the batch means.
    def nll_sum(logits):                     # CrossEntropy numerators, summed over rows
        mx = jnp.max(logits, axis=-1, keepdims=True)
        lse = jnp.log(jnp.sum(jnp.exp(logits - mx), axis=-1, keepdims=True)) + mx
        return jnp.sum(lse) - jnp.sum(lab * logits)

    def kl_sum(inp_logits, tgt_logits):      # KLDiv numerators (C-axis softmax)
        logp = _log_softmax(inp_logits)
        logq = _log_softmax(tgt_logits)
        return jnp.sum(jnp.exp(logq) * (logq - logp))

    def kl_sum_premax(inp, tgt, inp_max, tgt_max):   # reuse precomputed V-axis maxes
        zi = inp - inp_max[..., None]
        zt = tgt - tgt_max[..., None]
        logp = zi - jnp.log(jnp.sum(jnp.exp(zi), axis=-1, keepdims=True))
        logq = zt - jnp.log(jnp.sum(jnp.exp(zt), axis=-1, keepdims=True))
        return jnp.sum(jnp.exp(logq) * (logq - logp))

    partial_loss = ((nll_sum(r_max) + nll_sum(t_max)) * (1.0 / B)
                    + ALPHA * kl_sum(r_aligned, t_max) * (1.0 / B)
                    + BETA * kl_sum_premax(r3, t3, r_max, t_max) * (1.0 / (B * C)))

    # lane-dense per-tile partial sum; the wrapper picks [:, 0, 0] and sums.
    out_ref[...] = jnp.full((1, 8, 128), partial_loss, dtype=jnp.float32)


def _vmem_capacity():
    try:
        return int(pltpu.get_tpu_info().vmem_capacity_bytes)
    except Exception:
        return 64 * 1024 * 1024      # conservative (v7x per-TC VMEM)


def _num_tensorcores():
    # best-effort: v7x has 2 TensorCores per chip; v5e/v6e have 1.
    try:
        kind = (jax.devices()[0].device_kind or "").lower()
        if "v7" in kind:
            return 2
    except Exception:
        pass
    return 1


def _tile_batch(B, CV, H, budget_bytes, max_tb=None, min_tiles=1):
    # per batch row: double-buffered bf16 ent+pooled blocks (2 tensors x 2 bufs)
    # plus the single-buffered f32 upcast / score working set inside the body.
    per_row = 2 * 2 * CV * H * 2 + 2 * CV * H * 4       # = 16*CV*H bytes
    tb = max(1, budget_bytes // per_row)
    if max_tb is not None:
        tb = min(tb, max_tb)
    if min_tiles > 1:
        tb = min(tb, max(1, B // min_tiles))
    if tb >= B and min_tiles <= 1:
        return B
    # mention (TB,H) / label (TB,C) blocks: second-minor dim -> TB % 8 == 0 or TB == B
    nice = [d for d in range(8, B + 1, 8) if B % d == 0 and d <= tb]
    if nice:
        return max(nice)
    return B    # no suitable divisor; caller raises the VMEM limit to compensate


def mvd_loss(mention_emb, ent_emb, pooled, w_t, b_t, label_onehot, *, max_tb=None):
    B, C, V, H = ent_emb.shape
    CV = C * V

    # bf16 for the bandwidth-dominant reads; all math stays f32 in-kernel.
    # (In production emit bf16 from encode() so these casts fuse into the
    #  producers instead of costing an extra HBM round trip.)
    mention_emb = mention_emb.astype(jnp.bfloat16)
    ent2 = ent_emb.astype(jnp.bfloat16).reshape(B, CV, H)     # free metadata reshape
    pool2 = pooled.astype(jnp.bfloat16).reshape(B, CV, H)
    w_row = w_t.reshape(1, H).astype(jnp.bfloat16)
    b_t = b_t.astype(jnp.float32)
    label_onehot = label_onehot.astype(jnp.float32)

    vmem_cap = _vmem_capacity()
    min_tiles = 2 if (_num_tensorcores() >= 2 and B >= 16) else 1
    TB = _tile_batch(B, CV, H, int(vmem_cap * 0.5), max_tb=max_tb, min_tiles=min_tiles)
    assert B % TB == 0
    num_tiles = B // TB

    # VMEM limit: generous headroom, and guaranteed to cover the chosen tile
    # even when a single-tile fallback was forced.
    est_bytes = TB * (2 * 2 * CV * H * 2 + 2 * CV * H * 4) + (2 << 20)
    vmem_limit = min(int(vmem_cap * 0.98), max(int(vmem_cap * 0.85), est_bytes))

    kernel = partial(mvd_loss_kernel, B=B, C=C, V=V)
    cost = pl.CostEstimate(
        flops=int(4 * B * CV * H),
        transcendentals=int(6 * B * C * V),
        bytes_accessed=int(mention_emb.nbytes + ent2.nbytes + pool2.nbytes
                           + w_row.nbytes + b_t.nbytes + label_onehot.nbytes
                           + num_tiles * 8 * 128 * 4))

    smem = pltpu.MemorySpace.SMEM
    out = pl.pallas_call(
        kernel,
        out_shape=jax.ShapeDtypeStruct((num_tiles, 8, 128), jnp.float32),
        grid=(num_tiles,),
        in_specs=[
            pl.BlockSpec((TB, H), lambda i: (i, 0)),                    # mention_emb
            pl.BlockSpec((TB, CV, H), lambda i: (i, 0, 0)),             # ent_emb (B,CV,H)
            pl.BlockSpec((TB, CV, H), lambda i: (i, 0, 0)),             # pooled  (B,CV,H)
            pl.BlockSpec((1, H), lambda i: (0, 0)),                     # teacher weight
            pl.BlockSpec((1, 1), lambda i: (0, 0), memory_space=smem),  # teacher bias
            pl.BlockSpec((TB, C), lambda i: (i, 0)),                    # label one-hot
        ],
        out_specs=pl.BlockSpec((1, 8, 128), lambda i: (i, 0, 0)),
        compiler_params=pltpu.CompilerParams(
            dimension_semantics=("parallel",),     # partial sums -> no carried state
            vmem_limit_bytes=vmem_limit),
        cost_estimate=cost,
    )(mention_emb, ent2, pool2, w_row, b_t, label_onehot)
    return jnp.sum(out[:, 0, 0])


# ---------------- synthetic retriever / teacher parameters + glue ----------------
def init_params(key, vocab, hidden):
    k1, k2, k3, k4 = jax.random.split(key, 4)
    emb_r = jax.random.normal(k1, (vocab, hidden), jnp.float32) * 0.1  # retriever embeddings
    emb_t = jax.random.normal(k2, (vocab, hidden), jnp.float32) * 0.1  # teacher embeddings
    seg_t = jax.random.normal(k3, (2, hidden), jnp.float32) * 0.1      # teacher segment embeddings
    w_t = jax.random.normal(k4, (1, hidden), jnp.float32) * 0.1        # teacher scoring head
    b_t = jnp.zeros((1, 1), jnp.float32)
    return emb_r, emb_t, seg_t, w_t, b_t


def encode(params, mention_ids, entity_ids, input_ids, segment_ids):
    # TODO(synk): the original retriever/teacher are opaque BERT-style submodules;
    # they are replaced here by deterministic mean-pooled-embedding encoders.
    # The embedding-table gathers stay in plain JAX glue.
    emb_r, emb_t, seg_t, w_t, b_t = params
    mention_emb = jnp.take(emb_r, mention_ids, axis=0).mean(axis=1)     # (B, H)
    ent_emb = jnp.take(emb_r, entity_ids, axis=0).mean(axis=3)          # (B, C, V, H)
    tok = jnp.take(emb_t, input_ids, axis=0) + jnp.take(seg_t, segment_ids, axis=0)
    pooled = tok.mean(axis=3)                                           # (B, C, V, H)
    return mention_emb, ent_emb, pooled, w_t, b_t


def mvd_forward(params, mention_ids, entity_ids, input_ids, segment_ids, label, *, max_tb=None):
    mention_emb, ent_emb, pooled, w_t, b_t = encode(
        params, mention_ids, entity_ids, input_ids, segment_ids)
    C = ent_emb.shape[1]
    label_onehot = jax.nn.one_hot(label, C, dtype=jnp.float32)
    return mvd_loss(mention_emb, ent_emb, pooled, w_t, b_t, label_onehot, max_tb=max_tb)


# ---------------- pure-JAX reference (mirrors the PyTorch forward) ----------------
def mvd_forward_ref(params, mention_ids, entity_ids, input_ids, segment_ids, label):
    B, C, S, L = input_ids.shape
    mention_emb, ent_emb, pooled, w_t, b_t = encode(
        params, mention_ids, entity_ids, input_ids, segment_ids)
    # match the kernel's bf16 input quantization (math stays f32)
    q = lambda x: x.astype(jnp.bfloat16).astype(jnp.float32)
    mention_emb, ent_emb, pooled, w_t = q(mention_emb), q(ent_emb), q(pooled), q(w_t)

    r = jnp.einsum('bcvh,bh->bcv', ent_emb, mention_emb)
    t = jnp.einsum('bcvh,h->bcv', pooled, w_t[0]) + b_t[0, 0]
    idx = jnp.argmax(t, axis=-1)[..., None]
    r_aligned = jnp.take_along_axis(r, idx, axis=-1)[..., 0]
    r_max, t_max = r.max(-1), t.max(-1)

    def ce(logits):
        picked = jnp.take_along_axis(logits, label[:, None], axis=1)[:, 0]
        return jnp.mean(jax.nn.logsumexp(logits, axis=-1) - picked)

    def kl(inp, tgt, denom):
        lp = jax.nn.log_softmax(inp, -1)
        qq = jax.nn.softmax(tgt, -1)
        return jnp.sum(qq * (jnp.log(qq) - lp)) / denom

    return (ce(r_max) + ce(t_max)
            + ALPHA * kl(r_aligned, t_max, B)
            + BETA * kl(r.reshape(B * C, -1), t.reshape(B * C, -1), B * C))


if __name__ == "__main__":
    # S == number of views V.  B=16 with max_tb=8 -> 2 batch tiles (exercises the
    # grid / partial-sum accumulation path, and both cores on dual-TC parts).
    B, C, S, L, H, VOCAB = 16, 4, 8, 16, 32, 64
    key = jax.random.PRNGKey(0)
    kp, k1, k2, k3, k4, k5 = jax.random.split(key, 6)
    params = init_params(kp, VOCAB, H)

    mention_ids = jax.random.randint(k1, (B, L), 0, VOCAB)
    entity_ids = jax.random.randint(k2, (B, C, S, L), 0, VOCAB)
    input_ids = jax.random.randint(k3, (B, C, S, L), 0, VOCAB)
    segment_ids = jax.random.randint(k4, (B, C, S, L), 0, 2)
    label = jax.random.randint(k5, (B,), 0, C)

    loss = mvd_forward(params, mention_ids, entity_ids, input_ids, segment_ids,
                       label, max_tb=8)
    loss = jax.block_until_ready(loss)

    ref = mvd_forward_ref(params, mention_ids, entity_ids, input_ids, segment_ids, label)
    assert jnp.allclose(loss, ref, atol=1e-4, rtol=1e-4), (loss, ref)
    print("KERNEL_OK")
</pallas_src>

<mosaic_0001>
module attributes {stable_mosaic.version = 11 : i64} {
  func.func @mvd_loss_kernel(%arg0: i32, %arg1: memref<8x32xbf16, #tpu.memory_space<vmem>>, %arg2: memref<8x32x32xbf16, #tpu.memory_space<vmem>>, %arg3: memref<8x32x32xbf16, #tpu.memory_space<vmem>>, %arg4: memref<1x32xbf16, #tpu.memory_space<vmem>>, %arg5: memref<1x1xf32, #tpu.memory_space<smem>>, %arg6: memref<8x4xf32, #tpu.memory_space<vmem>>, %arg7: memref<1x8x128xf32, #tpu.memory_space<vmem>>) attributes {dimension_semantics = [#tpu.dimension_semantics<parallel>], iteration_bounds = array<i64: 2>, scalar_prefetch = 0 : i64, scratch_operands = 0 : i64, tpu.core_type = #tpu.core_type<tc>, window_params = [{transform_indices = @transform_0, window_bounds = array<i64: 8, 32>}, {transform_indices = @transform_1, window_bounds = array<i64: 8, 32, 32>}, {transform_indices = @transform_2, window_bounds = array<i64: 8, 32, 32>}, {pipeline_mode = #tpu.pipeline_mode<synchronous>, transform_indices = @transform_3, window_bounds = array<i64: 1, 32>}, {transform_indices = @transform_4, window_bounds = array<i64: 1, 1>}, {transform_indices = @transform_5, window_bounds = array<i64: 8, 4>}, {transform_indices = @transform_6, window_bounds = array<i64: 1, 8, 128>}]} {
    %c0 = arith.constant 0 : index
    %c0_0 = arith.constant 0 : index
    %0 = vector.load %arg1[%c0, %c0_0] : memref<8x32xbf16, #tpu.memory_space<vmem>>, vector<8x32xbf16>
    %1 = arith.extf %0 : vector<8x32xbf16> to vector<8x32xf32>
    %c0_1 = arith.constant 0 : index
    %c0_2 = arith.constant 0 : index
    %2 = vector.load %arg4[%c0_1, %c0_2] : memref<1x32xbf16, #tpu.memory_space<vmem>>, vector<1x32xbf16>
    %3 = arith.extf %2 : vector<1x32xbf16> to vector<1x32xf32>
    %c0_3 = arith.constant 0 : index
    %c0_4 = arith.constant 0 : index
    %4 = memref.load %arg5[%c0_3, %c0_4] : memref<1x1xf32, #tpu.memory_space<smem>>
    %c0_5 = arith.constant 0 : index
    %c0_6 = arith.constant 0 : index
    %5 = vector.load %arg6[%c0_5, %c0_6] : memref<8x4xf32, #tpu.memory_space<vmem>>, vector<8x4xf32>
    %c0_7 = arith.constant 0 : index
    %c0_8 = arith.constant 0 : index
    %c0_9 = arith.constant 0 : index
    %6 = vector.load %arg2[%c0_7, %c0_8, %c0_9] : memref<8x32x32xbf16, #tpu.memory_space<vmem>>, vector<8x32x32xbf16>
    %7 = arith.extf %6 : vector<8x32x32xbf16> to vector<8x32x32xf32>
    %c0_10 = arith.constant 0 : index
    %c0_11 = arith.constant 0 : index
    %c0_12 = arith.constant 0 : index
    %8 = vector.load %arg3[%c0_10, %c0_11, %c0_12] : memref<8x32x32xbf16, #tpu.memory_space<vmem>>, vector<8x32x32xbf16>
    %9 = arith.extf %8 : vector<8x32x32xbf16> to vector<8x32x32xf32>
    %10 = vector.shape_cast %1 : vector<8x32xf32> to vector<8x1x32xf32>
    %11 = vector.broadcast %10 : vector<8x1x32xf32> to vector<8x32x32xf32>
    %12 = arith.mulf %7, %11 : vector<8x32x32xf32>
    %cst = arith.constant dense<0.000000e+00> : vector<8x32xf32>
    %13 = vector.multi_reduction <add>, %12, %cst [2] : vector<8x32x32xf32> to vector<8x32xf32>
    %14 = vector.shape_cast %3 : vector<1x32xf32> to vector<1x1x32xf32>
    %15 = vector.broadcast %14 : vector<1x1x32xf32> to vector<8x32x32xf32>
    %16 = arith.mulf %9, %15 : vector<8x32x32xf32>
    %cst_13 = arith.constant dense<0.000000e+00> : vector<8x32xf32>
    %17 = vector.multi_reduction <add>, %16, %cst_13 [2] : vector<8x32x32xf32> to vector<8x32xf32>
    %18 = vector.broadcast %4 : f32 to vector<8x32xf32>
    %19 = arith.addf %17, %18 : vector<8x32xf32>
    %20 = vector.shape_cast %13 : vector<8x32xf32> to vector<8x4x8xf32>
    %21 = vector.shape_cast %19 : vector<8x32xf32> to vector<8x4x8xf32>
    %cst_14 = arith.constant dense<0xFF800000> : vector<8x4xf32>
    %22 = vector.multi_reduction <maximumf>, %21, %cst_14 [2] : vector<8x4x8xf32> to vector<8x4xf32>
    %cst_15 = arith.constant dense<0xFF800000> : vector<8x4xf32>
    %23 = vector.multi_reduction <maximumf>, %20, %cst_15 [2] : vector<8x4x8xf32> to vector<8x4xf32>
    %24 = tpu.iota {dimensions = array<i32: 2>} : vector<8x4x8xi32>
    %25 = vector.shape_cast %22 : vector<8x4xf32> to vector<8x4x1xf32>
    %26 = vector.broadcast %25 : vector<8x4x1xf32> to vector<8x4x8xf32>
    %27 = arith.cmpf oeq, %21, %26 : vector<8x4x8xf32>
    %c8_i32 = arith.constant 8 : i32
    %28 = vector.broadcast %c8_i32 : i32 to vector<8x4x8xi32>
    %29 = arith.select %27, %24, %28 : vector<8x4x8xi1>, vector<8x4x8xi32>
    %cst_16 = arith.constant dense<2147483647> : vector<8x4xi32>
    %30 = vector.multi_reduction <minsi>, %29, %cst_16 [2] : vector<8x4x8xi32> to vector<8x4xi32>
    %31 = vector.shape_cast %30 : vector<8x4xi32> to vector<8x4x1xi32>
    %32 = vector.broadcast %31 : vector<8x4x1xi32> to vector<8x4x8xi32>
    %33 = arith.cmpi eq, %24, %32 : vector<8x4x8xi32>
    %cst_17 = arith.constant 0.000000e+00 : f32
    %34 = vector.broadcast %cst_17 : f32 to vector<8x4x8xf32>
    %35 = arith.select %33, %20, %34 : vector<8x4x8xi1>, vector<8x4x8xf32>
    %cst_18 = arith.constant dense<0.000000e+00> : vector<8x4xf32>
    %36 = vector.multi_reduction <add>, %35, %cst_18 [2] : vector<8x4x8xf32> to vector<8x4xf32>
    %cst_19 = arith.constant dense<0xFF800000> : vector<8xf32>
    %37 = vector.multi_reduction <maximumf>, %23, %cst_19 [1] : vector<8x4xf32> to vector<8xf32>
    %38 = vector.shape_cast %37 : vector<8xf32> to vector<8x1xf32>
    %39 = vector.broadcast %38 : vector<8x1xf32> to vector<8x4xf32>
    %40 = arith.subf %23, %39 : vector<8x4xf32>
    %41 = math.exp %40 : vector<8x4xf32>
    %cst_20 = arith.constant dense<0.000000e+00> : vector<8xf32>
    %42 = vector.multi_reduction <add>, %41, %cst_20 [1] : vector<8x4xf32> to vector<8xf32>
    %43 = vector.shape_cast %42 : vector<8xf32> to vector<8x1xf32>
    %44 = math.log %43 : vector<8x1xf32>
    %45 = arith.addf %44, %38 : vector<8x1xf32>
    %46 = vector.shape_cast %45 : vector<8x1xf32> to vector<1x8x1xf32>
    %cst_21 = arith.constant dense<0.000000e+00> : vector<1xf32>
    %47 = vector.multi_reduction <add>, %46, %cst_21 [1, 2] : vector<1x8x1xf32> to vector<1xf32>
    %48 = vector.shape_cast %47 : vector<1xf32> to vector<1x1x1xf32>
    %49 = vector.extract %48[0, 0, 0] : f32 from vector<1x1x1xf32>
    %50 = arith.mulf %5, %23 : vector<8x4xf32>
    %51 = vector.shape_cast %50 : vector<8x4xf32> to vector<1x8x4xf32>
    %cst_22 = arith.constant dense<0.000000e+00> : vector<1xf32>
    %52 = vector.multi_reduction <add>, %51, %cst_22 [1, 2] : vector<1x8x4xf32> to vector<1xf32>
    %53 = vector.shape_cast %52 : vector<1xf32> to vector<1x1x1xf32>
    %54 = vector.extract %53[0, 0, 0] : f32 from vector<1x1x1xf32>
    %55 = arith.subf %49, %54 : f32
    %cst_23 = arith.constant dense<0xFF800000> : vector<8xf32>
    %56 = vector.multi_reduction <maximumf>, %22, %cst_23 [1] : vector<8x4xf32> to vector<8xf32>
    %57 = vector.shape_cast %56 : vector<8xf32> to vector<8x1xf32>
    %58 = vector.broadcast %57 : vector<8x1xf32> to vector<8x4xf32>
    %59 = arith.subf %22, %58 : vector<8x4xf32>
    %60 = math.exp %59 : vector<8x4xf32>
    %cst_24 = arith.constant dense<0.000000e+00> : vector<8xf32>
    %61 = vector.multi_reduction <add>, %60, %cst_24 [1] : vector<8x4xf32> to vector<8xf32>
    %62 = vector.shape_cast %61 : vector<8xf32> to vector<8x1xf32>
    %63 = math.log %62 : vector<8x1xf32>
    %64 = arith.addf %63, %57 : vector<8x1xf32>
    %65 = vector.shape_cast %64 : vector<8x1xf32> to vector<1x8x1xf32>
    %cst_25 = arith.constant dense<0.000000e+00> : vector<1xf32>
    %66 = vector.multi_reduction <add>, %65, %cst_25 [1, 2] : vector<1x8x1xf32> to vector<1xf32>
    %67 = vector.shape_cast %66 : vector<1xf32> to vector<1x1x1xf32>
    %68 = vector.extract %67[0, 0, 0] : f32 from vector<1x1x1xf32>
    %69 = arith.mulf %5, %22 : vector<8x4xf32>
    %70 = vector.shape_cast %69 : vector<8x4xf32> to vector<1x8x4xf32>
    %cst_26 = arith.constant dense<0.000000e+00> : vector<1xf32>
    %71 = vector.multi_reduction <add>, %70, %cst_26 [1, 2] : vector<1x8x4xf32> to vector<1xf32>
    %72 = vector.shape_cast %71 : vector<1xf32> to vector<1x1x1xf32>
    %73 = vector.extract %72[0, 0, 0] : f32 from vector<1x1x1xf32>
    %74 = arith.subf %68, %73 : f32
    %75 = arith.addf %55, %74 : f32
    %cst_27 = arith.constant 6.250000e-02 : f32
    %76 = arith.mulf %75, %cst_27 : f32
    %cst_28 = arith.constant dense<0xFF800000> : vector<8xf32>
    %77 = vector.multi_reduction <maximumf>, %36, %cst_28 [1] : vector<8x4xf32> to vector<8xf32>
    %78 = vector.shape_cast %77 : vector<8xf32> to vector<8x1xf32>
    %79 = vector.broadcast %78 : vector<8x1xf32> to vector<8x4xf32>
    %80 = arith.subf %36, %79 : vector<8x4xf32>
    %81 = math.exp %80 : vector<8x4xf32>
    %cst_29 = arith.constant dense<0.000000e+00> : vector<8xf32>
    %82 = vector.multi_reduction <add>, %81, %cst_29 [1] : vector<8x4xf32> to vector<8xf32>
    %83 = vector.shape_cast %82 : vector<8xf32> to vector<8x1xf32>
    %84 = math.log %83 : vector<8x1xf32>
    %85 = vector.broadcast %84 : vector<8x1xf32> to vector<8x4xf32>
    %86 = arith.subf %80, %85 : vector<8x4xf32>
    %cst_30 = arith.constant dense<0xFF800000> : vector<8xf32>
    %87 = vector.multi_reduction <maximumf>, %22, %cst_30 [1] : vector<8x4xf32> to vector<8xf32>
    %88 = vector.shape_cast %87 : vector<8xf32> to vector<8x1xf32>
    %89 = vector.broadcast %88 : vector<8x1xf32> to vector<8x4xf32>
    %90 = arith.subf %22, %89 : vector<8x4xf32>
    %91 = math.exp %90 : vector<8x4xf32>
    %cst_31 = arith.constant dense<0.000000e+00> : vector<8xf32>
    %92 = vector.multi_reduction <add>, %91, %cst_31 [1] : vector<8x4xf32> to vector<8xf32>
    %93 = vector.shape_cast %92 : vector<8xf32> to vector<8x1xf32>
    %94 = math.log %93 : vector<8x1xf32>
    %95 = vector.broadcast %94 : vector<8x1xf32> to vector<8x4xf32>
    %96 = arith.subf %90, %95 : vector<8x4xf32>
    %97 = math.exp %96 : vector<8x4xf32>
    %98 = arith.subf %96, %86 : vector<8x4xf32>
    %99 = arith.mulf %97, %98 : vector<8x4xf32>
    %100 = vector.shape_cast %99 : vector<8x4xf32> to vector<1x8x4xf32>
    %cst_32 = arith.constant dense<0.000000e+00> : vector<1xf32>
    %101 = vector.multi_reduction <add>, %100, %cst_32 [1, 2] : vector<1x8x4xf32> to vector<1xf32>
    %102 = vector.shape_cast %101 : vector<1xf32> to vector<1x1x1xf32>
    %103 = vector.extract %102[0, 0, 0] : f32 from vector<1x1x1xf32>
    %cst_33 = arith.constant 3.000000e-01 : f32
    %104 = arith.mulf %cst_33, %103 : f32
    %cst_34 = arith.constant 6.250000e-02 : f32
    %105 = arith.mulf %104, %cst_34 : f32
    %106 = arith.addf %76, %105 : f32
    %107 = vector.shape_cast %23 : vector<8x4xf32> to vector<8x4x1xf32>
    %108 = vector.broadcast %107 : vector<8x4x1xf32> to vector<8x4x8xf32>
    %109 = arith.subf %20, %108 : vector<8x4x8xf32>
    %110 = vector.shape_cast %22 : vector<8x4xf32> to vector<8x4x1xf32>
    %111 = vector.broadcast %110 : vector<8x4x1xf32> to vector<8x4x8xf32>
    %112 = arith.subf %21, %111 : vector<8x4x8xf32>
    %113 = math.exp %109 : vector<8x4x8xf32>
    %cst_35 = arith.constant dense<0.000000e+00> : vector<8x4xf32>
    %114 = vector.multi_reduction <add>, %113, %cst_35 [2] : vector<8x4x8xf32> to vector<8x4xf32>
    %115 = vector.shape_cast %114 : vector<8x4xf32> to vector<8x4x1xf32>
    %116 = math.log %115 : vector<8x4x1xf32>
    %117 = vector.broadcast %116 : vector<8x4x1xf32> to vector<8x4x8xf32>
    %118 = arith.subf %109, %117 : vector<8x4x8xf32>
    %119 = math.exp %112 : vector<8x4x8xf32>
    %cst_36 = arith.constant dense<0.000000e+00> : vector<8x4xf32>
    %120 = vector.multi_reduction <add>, %119, %cst_36 [2] : vector<8x4x8xf32> to vector<8x4xf32>
    %121 = vector.shape_cast %120 : vector<8x4xf32> to vector<8x4x1xf32>
    %122 = math.log %121 : vector<8x4x1xf32>
    %123 = vector.broadcast %122 : vector<8x4x1xf32> to vector<8x4x8xf32>
    %124 = arith.subf %112, %123 : vector<8x4x8xf32>
    %125 = math.exp %124 : vector<8x4x8xf32>
    %126 = arith.subf %124, %118 : vector<8x4x8xf32>
    %127 = arith.mulf %125, %126 : vector<8x4x8xf32>
    %128 = vector.shape_cast %127 : vector<8x4x8xf32> to vector<1x8x4x8xf32>
    %cst_37 = arith.constant dense<0.000000e+00> : vector<1xf32>
    %129 = vector.multi_reduction <add>, %128, %cst_37 [1, 2, 3] : vector<1x8x4x8xf32> to vector<1xf32>
    %130 = vector.shape_cast %129 : vector<1xf32> to vector<1x1x1x1xf32>
    %131 = vector.extract %130[0, 0, 0, 0] : f32 from vector<1x1x1x1xf32>
    %cst_38 = arith.constant 1.000000e-01 : f32
    %132 = arith.mulf %cst_38, %131 : f32
    %cst_39 = arith.constant 1.562500e-02 : f32
    %133 = arith.mulf %132, %cst_39 : f32
    %134 = arith.addf %106, %133 : f32
    %135 = vector.broadcast %134 : f32 to vector<1x8x128xf32>
    %c0_40 = arith.constant 0 : index
    %c0_41 = arith.constant 0 : index
    %c0_42 = arith.constant 0 : index
    %136 = vector.load %arg7[%c0_40, %c0_41, %c0_42] : memref<1x8x128xf32, #tpu.memory_space<vmem>>, vector<1x8x128xf32>
    tpu.vector_store %arg7[%c0_40, %c0_41, %c0_42], %135 {strides = array<i32>} : memref<1x8x128xf32, #tpu.memory_space<vmem>>, vector<1x8x128xf32>,
    return
  }
  func.func @transform_0(%arg0: i32) -> (i32, i32) {
    %c0_i32 = arith.constant 0 : i32
    %c0_i32_0 = arith.constant 0 : i32
    return %arg0, %c0_i32 : i32, i32
  }
  func.func @transform_1(%arg0: i32) -> (i32, i32, i32) {
    %c0_i32 = arith.constant 0 : i32
    %c0_i32_0 = arith.constant 0 : i32
    %c0_i32_1 = arith.constant 0 : i32
    return %arg0, %c0_i32, %c0_i32_0 : i32, i32, i32
  }
  func.func @transform_2(%arg0: i32) -> (i32, i32, i32) {
    %c0_i32 = arith.constant 0 : i32
    %c0_i32_0 = arith.constant 0 : i32
    %c0_i32_1 = arith.constant 0 : i32
    return %arg0, %c0_i32, %c0_i32_0 : i32, i32, i32
  }
  func.func @transform_3(%arg0: i32) -> (i32, i32) {
    %c0_i32 = arith.constant 0 : i32
    %c0_i32_0 = arith.constant 0 : i32
    %c0_i32_1 = arith.constant 0 : i32
    return %c0_i32, %c0_i32_0 : i32, i32
  }
  func.func @transform_4(%arg0: i32) -> (i32, i32) {
    %c0_i32 = arith.constant 0 : i32
    %c0_i32_0 = arith.constant 0 : i32
    %c0_i32_1 = arith.constant 0 : i32
    return %c0_i32, %c0_i32_0 : i32, i32
  }
  func.func @transform_5(%arg0: i32) -> (i32, i32) {
    %c0_i32 = arith.constant 0 : i32
    %c0_i32_0 = arith.constant 0 : i32
    return %arg0, %c0_i32 : i32, i32
  }
  func.func @transform_6(%arg0: i32) -> (i32, i32, i32) {
    %c0_i32 = arith.constant 0 : i32
    %c0_i32_0 = arith.constant 0 : i32
    %c0_i32_1 = arith.constant 0 : i32
    return %arg0, %c0_i32, %c0_i32_0 : i32, i32, i32
  }
}

</mosaic_0001>

<bundles_post_ra>
// kernel: tpu_custom_call.1
= control target key start
LH: loop header
LB: loop body
LE: loop exit
PB: predicated region body
PF: predicated region fallthrough
CT: control target
= control target key end

     0   :  { %s5156_s0 = inlined_call_operand.vmem [shape: bf16[16,32], index: 0, kind: input, shape index: {}]   ;;  %s5157_s1 = inlined_call_operand.hbm [shape: bf16[16,32,32], index: 1, kind: input, shape index: {}]   ;;  %s5158_s2 = inlined_call_operand.hbm [shape: bf16[16,32,32], index: 2, kind: input, shape index: {}]   ;;  %s5159_s3 = inlined_call_operand.vmem [shape: bf16[1,32], index: 3, kind: input, shape index: {}]   ;;  %s5160_s4 = inlined_call_operand.<no memory space> [shape: f32[1,1], index: 4, kind: input, shape index: {}]   ;;  %s5161_s5 = inlined_call_operand.vmem [shape: f32[16,4], index: 5, kind: input, shape index: {}]   ;;  %s5162_s6 = inlined_call_operand.hbm [shape: f32[2,8,128], index: 6, kind: output, shape index: {}]  }
   0x1   :  { %5184 = sst [smem:[#allocation29_spill]] %s5156_s0 }
   0x2   :  { %5185 = sst [smem:[#allocation30_spill]] %s5157_s1 }
   0x3   :  { %5186 = sst [smem:[#allocation31_spill]] %s5158_s2 }
   0x4   :  { %5187 = sst [smem:[#allocation32_spill]] %s5159_s3 }
   0x5   :  { %5188 = sst [smem:[#allocation33_spill]] %s5161_s5 }
   0x6   :  { %11 = sst [smem:[#allocation2]] %s5160_s4 }
   0x7   :  { %12 = vsyncpa [#allocation4], 0 }
   0x8   :  { %14 = vsyncpa [#allocation4 + $0x1], 0 }
   0x9   :  { %15 = vsyncpa [#allocation7], 0 }
   0xa   :  { %17 = vsyncpa [#allocation7 + $0x1], 0 }
   0xb   :  { %18 = vsyncpa [#allocation5], 0 }
   0xc   :  { %20 = vsyncpa [#allocation5 + $0x1], 0  ;;  %s3578_s23 = smov 0   ;;  %s3580_s24 = smov 0  }
   0xd   :  { %s3582_s25 = smov 0   ;;  %s3584_s26 = smov 0  }
   0xe LB: > { %s3599_s4 = sadd.s32 4294967295, %s3528_s26   ;;  %s2993_s27 = sadd.s32 4294967294, %s3528_s26   ;;  %s3528_s26 = sphi %s3584_s26, %s5243_s26   ;;  %s3524_s25 = sphi %s3582_s25, %s5242_s25   ;;  %s3520_s24 = sphi %s3580_s24, %s5241_s24   ;;  %s3516_s23 = sphi %s3578_s23, %s5240_s23  }
   0xf   : > { %s3603_s28 = sadd.s32 1, %s3528_s26   ;;  %s59_s29 = sadd.s32 1, %s3524_s25 }
  0x10   : > { %s56_s30 = ssub.s32 %s3528_s26, %s3603_s28  ;;  %p66_p0 = scmp.ne.s32.totalorder %s3524_s25, %s3520_s24 }
  0x11   : > { %p57_p1 = scmp.eq.s32.totalorder %s56_s30, 0  ;;  %p67_p2 = scmp.eq.s32.totalorder %s3528_s26, 0 }
  0x12   : > { %p72_p3 = scmp.ne.s32.totalorder %s3520_s24, %s3516_s23  ;;  %p73_p4 = scmp.eq.s32.totalorder %s3599_s4, 0 }
  0x13   : > { %s3615_s7 = scalar_select %p57_p1, %s3524_s25, %s59_s29  }
  0x14   : > { %p3617_p5 = por %p67_p2, %p66_p0  ;;  %p3621_p6 = por %p73_p4, %p72_p3 }
  0x15   : > { %5189 = sst [smem:[#allocation12_spill]] %s3615_s7  ;;  %p190_p7 = scmp.eq.s32.totalorder %s3599_s4, 1 }
  0x16   : > { %s5191_s9 = scalar_select %p3621_p6, 1, 0 }
  0x17   : > { %p196_p8 = scmp.eq.s32.totalorder %s2993_s27, 1  ;;  %p3205_p10 = scmp.lt.s32.totalorder %s3528_s26, 2 }
  0x18   : > { %p3628_p11 = por %p190_p7, %p66_p0  ;;  %s3637_s12 = sand.u32 1, %s3524_s25  }
  0x19   : > { %p3632_p12 = por %p196_p8, %p72_p3  ;;  %s3015_s13 = sshll.u32 %s3528_s26, 11 }
  0x1a   : > { %s5192_s10 = scalar_select %p3628_p11, 1, 0 }
  0x1b   : > { %s5193_s11 = scalar_select %p3632_p12, 1, 0 }
  0x1c   : > { %s2996_s14 = sshll.u32 %s3637_s12, 7  ;;  %s5194_s1 = sld [smem:[#allocation30_spill]] }
  0x1d   : > { %s233_s18 = scalar_lea.vmem [#allocation3], %s2996_s14  ;;  %p3652_p13 = pnand %p3205_p10, %p3617_p5 }
  0x1e   : > { %s241_s19 = sshll.u32 %s233_s18, 4  ;;  %s230_s21 = scalar_lea.sflag [#allocation4], %s3637_s12  ;;  %s3656_s19 = int_to_ptr.vmem [resolvable:$true] %s241_s19 }
  0x1f   : > { %p3400_p1 = pneg %p3652_p13 }
  0x22   : > { %s3646_s17 = scalar_lea.hbm %s5194_s1, %s3015_s13  ;;  %s3403_s30 = scalar_lea.hbm %s5194_s1, 4096 }
  0x23   : > { %s3398_s22 = scalar_lea.hbm %s3646_s17, 2048  ;;  %p3404_p4 = scmp.lt.u32.totalorder %s3646_s17, %s5194_s1 }
  0x24   : > { %p3399_p0 = scmp.ne.s32.totalorder %s3646_s17, %s3398_s22  ;;  %p3405_p5 = scmp.lt.u32.totalorder %s3403_s30, %s3398_s22 }
  0x25   : > { %p3407_p8 = scmp.lt.u32.totalorder %s3398_s22, %s3646_s17 }
  0x26   : > { %p3401_p2 = pnand %p3400_p1, %p3399_p0  ;;  %p3406_p7 = por %p3405_p5, %p3404_p4 }
  0x28   : > { %p3402_p3 = pneg %p3401_p2  ;;  %p3408_p10 = por %p3407_p8, %p3406_p7 }
  0x2a   : > { %p3409_p9 = pnand %p3408_p10, %p3402_p3 }
  0x2c   : > { %3412 = shalt.err (!%p3409_p9)
}
  0x2d   : > { %s3413_s16 = scalar_lea.vmem %s3656_s19, 2048  ;;  %s3530_s18 = smov [#allocation3]  }
  0x2e   : > { %p3414_p0 = scmp.ne.s32.totalorder %s3656_s19, %s3413_s16  ;;  %s3418_s27 = sshll.u32 %s3530_s18, 4  ;;  %s3419_s27 = int_to_ptr.vmem [resolvable:$false] %s3418_s27 }
  0x2f   : > { %s3420_s29 = scalar_lea.vmem %s3419_s27, 4096  ;;  %p3421_p11 = scmp.lt.s32.totalorder %s3656_s19, %s3419_s27 }
  0x30   : > { %p3416_p2 = pnand %p3414_p0, %p3400_p1  ;;  %p3422_p4 = scmp.lt.s32.totalorder %s3420_s29, %s3413_s16 }
  0x32   : > { %p3417_p12 = pneg %p3416_p2  ;;  %p3423_p5 = por %p3422_p4, %p3421_p11 }
  0x34   : > { %p3424_p7 = pnand %p3423_p5, %p3417_p12 }
  0x36   : > { %3427 = shalt.err (!%p3424_p7)
}
  0x37   : > { %s5164_s22 = smov 64   ;;  %s3532_s30 = smov 4  }
  0x38   : > { %3197 = dma.hbm_to_vmem [thread:$0]  (!%p3652_p13), %s3646_s17, 2048, %s3656_s19, %s230_s21, %s5164_s22, %s5164_s22, %s3532_s30  }
  0x39   : > { %p3004_p9 = scmp.ge.s32.totalorder %s3528_s26, 1  ;;  %p278_p11 = scmp.lt.s32.totalorder %s3528_s26, 3 }
  0x3a   : > { %s5197_s2 = sld [smem:[#allocation31_spill]]  ;;  %s255_s27 = scalar_lea.vmem [#allocation6], %s2996_s14 }
  0x3b   : > { %p3691_p12 = pnand %p3004_p9, %p278_p11  ;;  %s263_s29 = sshll.u32 %s255_s27, 4  ;;  %s3704_s29 = int_to_ptr.vmem [resolvable:$true] %s263_s29 }
  0x3c   : > { %s252_s17 = scalar_lea.sflag [#allocation7], %s3637_s12 }
  0x40   : > { %s3700_s18 = scalar_lea.hbm %s5197_s2, %s3015_s13  ;;  %s3433_s13 = scalar_lea.hbm %s5197_s2, 4096 }
  0x41   : > { %s3428_s19 = scalar_lea.hbm %s3700_s18, 2048  ;;  %p3434_p0 = scmp.lt.u32.totalorder %s3700_s18, %s5197_s2 }
  0x42   : > { %p3429_p3 = scmp.ne.s32.totalorder %s3700_s18, %s3428_s19  ;;  %p3435_p2 = scmp.lt.u32.totalorder %s3433_s13, %s3428_s19 }
  0x43   : > { %p3437_p5 = scmp.lt.u32.totalorder %s3428_s19, %s3700_s18 }
  0x44   : > { %p3431_p8 = pnand %p3429_p3, %p3400_p1  ;;  %p3436_p4 = por %p3435_p2, %p3434_p0 }
  0x46   : > { %p3432_p10 = pneg %p3431_p8  ;;  %p3438_p7 = por %p3437_p5, %p3436_p4 }
  0x48   : > { %p3439_p9 = pnand %p3438_p7, %p3432_p10 }
  0x4a   : > { %3442 = shalt.err (!%p3439_p9)
}
  0x4b   : > { %s3443_s14 = scalar_lea.vmem %s3704_s29, 2048  ;;  %s3533_s27 = smov [#allocation6]  }
  0x4c   : > { %p3444_p11 = scmp.ne.s32.totalorder %s3704_s29, %s3443_s14  ;;  %s3448_s21 = sshll.u32 %s3533_s27, 4  ;;  %s3449_s21 = int_to_ptr.vmem [resolvable:$false] %s3448_s21 }
  0x4d   : > { %s3450_s22 = scalar_lea.vmem %s3449_s21, 4096  ;;  %p3451_p6 = scmp.lt.s32.totalorder %s3704_s29, %s3449_s21 }
  0x4e   : > { %p3446_p3 = pnand %p3444_p11, %p3400_p1  ;;  %p3452_p0 = scmp.lt.s32.totalorder %s3450_s22, %s3443_s14 }
  0x50   : > { %p3447_p8 = pneg %p3446_p3  ;;  %p3453_p2 = por %p3452_p0, %p3451_p6 }
  0x52   : > { %p3454_p4 = pnand %p3453_p2, %p3447_p8 }
  0x54   : > { %3457 = shalt.err (!%p3454_p4)
}
  0x55   : > { %s5198_s19 = smov 64   ;;  %282 = sbr.rel (%p3691_p12) target bundleno = 2080 (0x820), region = 44 }
  0x56   : > { %3200 = dma.hbm_to_vmem [thread:$0]  (!%p3652_p13), %s3700_s18, 2048, %s3704_s29, %s252_s17, %s5198_s19, %s5198_s19, %s3532_s30  }
  0x5c   : > { %s3738_s15 = sand.u32 1, %s3520_s24   ;;  %p5199_p6 = scmp.ne.s32.totalorder %s5191_s9, 0 }
  0x5d   : > { %s3005_s13 = sshll.u32 %s3738_s15, 7  ;;  %s285_s16 = scalar_lea.sflag [#allocation4], %s3738_s15 }
  0x5e   : > { %s3742_s20 = scalar_lea.vmem [#allocation3], %s3005_s13 }
  0x5f   : > { %3503 = dma.done.wait (%p5199_p6), %s285_s16, 2048  }
  0x60   : > { %3505 = vsyncadd (%p5199_p6), %s285_s16, 4294965248  ;;  %s294_s12 = scalar_lea.sflag [#allocation7], %s3738_s15  ;;  %s3749_s30 = scalar_lea.vmem [#allocation6], %s3005_s13 }
  0x61   : > { %3507 = dma.done.wait (%p5199_p6), %s294_s12, 2048  }
  0x62   : > { %3509 = vsyncadd (%p5199_p6), %s294_s12, 4294965248  ;;  %v488_v0 = vlaneseq  ;;  %s5200_s3 = sld [smem:[#allocation32_spill]]  ;;  %v3161_v4 = vld [vmem:[%s3749_s30 + $0x8] sm:$0xff]   ;;  %v3083_v5 = vld [vmem:[%s3749_s30] sm:$0xff]   ;;  %vm605_vm0 = vcmask 261120   ;;  %v3534_v57 = vmov 0  }
  0x63   : > { %v3088_v7 = vunpack.c.l.bf16 %v3161_v4  ;;  %v3084_v8 = vunpack.c.l.bf16 %v3083_v5  ;;  %v3089_v9 = vunpack.c.h.bf16 %v3161_v4  ;;  %v3162_v10 = vld [vmem:[%s3749_s30 + $0x10] sm:$0xff]   ;;  %v3085_v11 = vunpack.c.h.bf16 %v3083_v5  ;;  %v3163_v19 = vld [vmem:[%s3749_s30 + $0x18] sm:$0xff]   ;;  %v3164_v28 = vld [vmem:[%s3749_s30 + $0x20] sm:$0xff]   ;;  %3246 = vset.pattern.permute.xlu0 %v3534_v57  ;;  %3247 = vset.pattern.permute.xlu1 %v3534_v57  ;;  %p339_p13 = scmp.lt.s32.totalorder %s3599_s4, 1  ;;  %s5201_s0 = sld [smem:[#allocation29_spill]] }
  0x64   : > { %v3756_v1 = vshrl.u32 %v488_v0, 7  ;;  %v3093_v13 = vunpack.c.h.bf16 %v3162_v10  ;;  %v3092_v14 = vunpack.c.l.bf16 %v3162_v10  ;;  %v3097_v22 = vunpack.c.h.bf16 %v3163_v19  ;;  %v3165_v33 = vld [vmem:[%s3749_s30 + $0x28] sm:$0xff]   ;;  %v3166_v39 = vld [vmem:[%s3749_s30 + $0x30] sm:$0xff]   ;;  %v3167_v46 = vld [vmem:[%s3749_s30 + $0x38] sm:$0xff]   ;;  %s353_s21 = sld [smem:[#allocation2]]  ;;  %s5232_s5 = sld [smem:[#allocation33_spill]] }
  0x65   : > { %v3096_v23 = vunpack.c.l.bf16 %v3163_v19  ;;  %v3101_v30 = vunpack.c.h.bf16 %v3164_v28  ;;  %v3100_v35 = vunpack.c.l.bf16 %v3164_v28  ;;  %v3105_v37 = vunpack.c.h.bf16 %v3165_v33  ;;  %v3168_v53 = vld [vmem:[%s3749_s30 + $0x40] sm:$0xff]   ;;  %v3169_v61 = vld [vmem:[%s3749_s30 + $0x48] sm:$0xff]   ;;  %s3815_s9 = scalar_select %p339_p13, %s3599_s4, 1 }
  0x66   : > { %v3759_v2 = vsub.s32 0, %v3756_v1  ;;  %v3104_v42 = vunpack.c.l.bf16 %v3165_v33  ;;  %v3109_v44 = vunpack.c.h.bf16 %v3166_v39  ;;  %v3108_v49 = vunpack.c.l.bf16 %v3166_v39  ;;  %s3007_s14 = sshll.u32 %s3738_s15, 3  ;;  %p5236_p12 = scmp.ne.s32.totalorder %s5192_s10, 0 }
  0x67   : > { %v3113_v52 = vunpack.c.h.bf16 %v3167_v46  ;;  %v3112_v56 = vunpack.c.l.bf16 %v3167_v46  ;;  %v3117_v59 = vunpack.c.h.bf16 %v3168_v53  ;;  %v3121_v5 = vunpack.c.h.bf16 %v3169_v61  ;;  %s3008_s29 = sshll.u32 %s3815_s9, 2  ;;  %s3009_s22 = sshll.u32 %s3815_s9, 3 }
  0x68   : > { %v351_v3 = vld [vmem:[%s5200_s3] sm:$0x1]  ;;  %v3120_v10 = vunpack.c.l.bf16 %v3169_v61  ;;  %vm1125_vm1 = vcmask 1041409   ;;  %vm1127_vm2 = vcmask 1042434   ;;  %vm1129_vm3 = vcmask 1043459   ;;  %s338_s2 = scalar_lea.vmem [#allocation8], %s3007_s14 }
  0x69   : > { %v352_v6 = vunpack.c.l.bf16 %v351_v3  ;;  %v3116_v3 = vunpack.c.l.bf16 %v3168_v53  ;;  %s342_s27 = scalar_lea.vmem %s5201_s0, %s3008_s29  ;;  %v3019_v61 = vld [vmem:[%s3742_s20] sm:$0xff]   ;;  %vm1131_vm4 = vcmask 1044484   ;;  %vm1133_vm5 = vcmask 1045509   ;;  %s3011_s0 = sshll.u32 %s3599_s4, 7 }
  0x6a   : > { %vm1135_vm6 = vcmask 1046534   ;;  %vm1137_vm7 = vcmask 1047559   ;;  %vm1588_vm8 = vcmask 60416   ;;  %s348_s16 = scalar_lea.vmem %s5232_s5, %s3009_s22  ;;  %s2876_s3 = sshll.u32 %s338_s2, 4  ;;  %s5114_s3 = int_to_ptr.vmem [resolvable:$true] %s2876_s3 }
  0x6b   : > { %v3768_v12 = vrot.slane %v352_v6, %v3759_v2  ;;  %s3539_s4 = smov [#allocation8]  }
  0x6d   : > { %v708_v15 = vmul.f32 %v3088_v7, %v3768_v12  ;;  %v706_v16 = vmul.f32 %v3084_v8, %v3768_v12  ;;  %v709_v17 = vmul.f32 %v3089_v9, %v3768_v12  ;;  %v707_v18 = vmul.f32 %v3085_v11, %v3768_v12  ;;  %v3170_v7 = vld [vmem:[%s3749_s30 + $0x50] sm:$0xff]  }
  0x6e   : > { %v711_v26 = vmul.f32 %v3093_v13, %v3768_v12  ;;  %v710_v27 = vmul.f32 %v3092_v14, %v3768_v12  ;;  %v713_v29 = vmul.f32 %v3097_v22, %v3768_v12  ;;  %v712_v34 = vmul.f32 %v3096_v23, %v3768_v12 }
  0x6f   : > { %v744_v20 = vsel %vm605_vm0, %v708_v15, 0.0  ;;  %v738_v21 = vsel %vm605_vm0, %v706_v16, 0.0  ;;  %v747_v24 = vsel %vm605_vm0, %v709_v17, 0.0  ;;  %v741_v25 = vsel %vm605_vm0, %v707_v18, 0.0  ;;  %v3171_v15 = vld [vmem:[%s3749_s30 + $0x58] sm:$0xff]  }
  0x70   : > { %745 = vadd.xlane.f32.xlu1 %v744_v20  ;;  %739 = vadd.xlane.f32.xlu0 %v738_v21  ;;  %v753_v31 = vsel %vm605_vm0, %v711_v26, 0.0  ;;  %v750_v32 = vsel %vm605_vm0, %v710_v27, 0.0  ;;  %v715_v36 = vmul.f32 %v3101_v30, %v3768_v12  ;;  %v759_v38 = vsel %vm605_vm0, %v713_v29, 0.0 }
  0x71   : > { %v756_v40 = vsel %vm605_vm0, %v712_v34, 0.0  ;;  %v714_v41 = vmul.f32 %v3100_v35, %v3768_v12  ;;  %v717_v43 = vmul.f32 %v3105_v37, %v3768_v12  ;;  %v716_v48 = vmul.f32 %v3104_v42, %v3768_v12 }
  0x72   : > { %v765_v45 = vsel %vm605_vm0, %v715_v36, 0.0  ;;  %v719_v51 = vmul.f32 %v3109_v44, %v3768_v12  ;;  %v718_v55 = vmul.f32 %v3108_v49, %v3768_v12  ;;  %v721_v58 = vmul.f32 %v3113_v52, %v3768_v12  ;;  %v349_v36 = vld [vmem:[%s342_s27] sm:$0xf]  ;;  %v3175_v49 = vld [vmem:[%s3749_s30 + $0x78] sm:$0xff]  }
  0x73   : > { %v762_v47 = vsel %vm605_vm0, %v714_v41, 0.0  ;;  %v771_v50 = vsel %vm605_vm0, %v717_v43, 0.0  ;;  %v768_v54 = vsel %vm605_vm0, %v716_v48, 0.0  ;;  %v720_v63 = vmul.f32 %v3112_v56, %v3768_v12  ;;  %v3174_v41 = vld [vmem:[%s3749_s30 + $0x70] sm:$0xff]  }
  0x74   : > { %748 = vadd.xlane.f32.xlu1 %v747_v24  ;;  %742 = vadd.xlane.f32.xlu0 %v741_v25  ;;  %v777_v60 = vsel %vm605_vm0, %v719_v51, 0.0  ;;  %v774_v62 = vsel %vm605_vm0, %v718_v55, 0.0  ;;  %v723_v4 = vmul.f32 %v3117_v59, %v3768_v12  ;;  %v783_v6 = vsel %vm605_vm0, %v721_v58, 0.0  ;;  %v3172_v24 = vld [vmem:[%s3749_s30 + $0x60] sm:$0xff]  }
  0x75   : > { %v780_v8 = vsel %vm605_vm0, %v720_v63, 0.0  ;;  %v722_v9 = vmul.f32 %v3116_v3, %v3768_v12  ;;  %v725_v11 = vmul.f32 %v3121_v5, %v3768_v12  ;;  %v3125_v13 = vunpack.c.h.bf16 %v3170_v7 }
  0x76   : > { %v789_v14 = vsel %vm605_vm0, %v723_v4, 0.0  ;;  %v724_v17 = vmul.f32 %v3120_v10, %v3768_v12  ;;  %v3124_v18 = vunpack.c.l.bf16 %v3170_v7  ;;  %v3129_v20 = vunpack.c.h.bf16 %v3171_v15 }
  0x77   : > { %v786_v16 = vsel %vm605_vm0, %v722_v9, 0.0  ;;  %v795_v19 = vsel %vm605_vm0, %v725_v11, 0.0  ;;  %v3535_v21 = vmov 1966171168   ;;  %v727_v23 = vmul.f32 %v3125_v13, %v3768_v12 }
  0x78   : > { %754 = vadd.xlane.f32.xlu1 %v753_v31  ;;  %751 = vadd.xlane.f32.xlu0 %v750_v32  ;;  %v486_v22 = vunpack.c.l.s4 %v3535_v21  ;;  %v792_v25 = vsel %vm605_vm0, %v724_v17, 0.0  ;;  %v726_v26 = vmul.f32 %v3124_v18, %v3768_v12  ;;  %v3128_v27 = vunpack.c.l.bf16 %v3171_v15  ;;  %v3173_v32 = vld [vmem:[%s3749_s30 + $0x68] sm:$0xff]  }
  0x79   : > { %v729_v28 = vmul.f32 %v3129_v20, %v3768_v12  ;;  %v3133_v29 = vunpack.c.h.bf16 %v3172_v24  ;;  %v801_v31 = vsel %vm605_vm0, %v727_v23, 0.0  ;;  %v3132_v35 = vunpack.c.l.bf16 %v3172_v24 }
  0x7a   : > { %v487_v30 = vunpack.c.0.s8 %v486_v22  ;;  %v798_v33 = vsel %vm605_vm0, %v726_v26, 0.0  ;;  %v728_v34 = vmul.f32 %v3128_v27, %v3768_v12  ;;  %v3137_v39 = vunpack.c.h.bf16 %v3173_v32 }
  0x7b   : > { %v807_v37 = vsel %vm605_vm0, %v729_v28, 0.0  ;;  %v730_v43 = vmul.f32 %v3132_v35, %v3768_v12  ;;  %v3136_v44 = vunpack.c.l.bf16 %v3173_v32  ;;  %v3141_v48 = vunpack.c.h.bf16 %v3174_v41 }
  0x7c   : > { %760 = vadd.xlane.f32.xlu1 %v759_v38  ;;  %757 = vadd.xlane.f32.xlu0 %v756_v40  ;;  %v731_v38 = vmul.f32 %v3133_v29, %v3768_v12  ;;  %v3838_v40 = vsub.s32 %v487_v30, %v3756_v1  ;;  %v804_v42 = vsel %vm605_vm0, %v728_v34, 0.0  ;;  %v3140_v52 = vunpack.c.l.bf16 %v3174_v41 }
  0x7d   : > { %v732_v51 = vmul.f32 %v3136_v44, %v3768_v12  ;;  %v3145_v55 = vunpack.c.h.bf16 %v3175_v49  ;;  %v3144_v56 = vunpack.c.l.bf16 %v3175_v49  ;;  %v3020_v5 = vunpack.c.l.bf16 %v3019_v61 }
  0x7e   : > { %v813_v46 = vsel %vm605_vm0, %v731_v38, 0.0  ;;  %v734_v59 = vmul.f32 %v3140_v52, %v3768_v12  ;;  %v3021_v7 = vunpack.c.h.bf16 %v3019_v61 }
  0x7f   : > { %v816_v58 = vsel %vm605_vm0, %v732_v51, 0.0  ;;  %v737_v63 = vmul.f32 %v3145_v55, %v3768_v12  ;;  %v736_v3 = vmul.f32 %v3144_v56, %v3768_v12 }
  0x80   : > { %766 = vadd.xlane.f32.xlu1 %v765_v45  ;;  %763 = vadd.xlane.f32.xlu0 %v762_v47  ;;  %v3843_v45 = vunpack.c.l.bf16 %v349_v36  ;;  %v733_v47 = vmul.f32 %v3137_v39, %v3768_v12  ;;  %v822_v4 = vsel %vm605_vm0, %v734_v59, 0.0 }
  0x81   : > { %v828_v9 = vsel %vm605_vm0, %v736_v3, 0.0 }
  0x82   : > { %v3852_v53 = vrot.slane %v3843_v45, %v3838_v40  ;;  %v819_v57 = vsel %vm605_vm0, %v733_v47, 0.0 }
  0x84   : > { %772 = vadd.xlane.f32.xlu1 %v771_v50  ;;  %769 = vadd.xlane.f32.xlu0 %v768_v54  ;;  %v810_v50 = vsel %vm605_vm0, %v730_v43, 0.0  ;;  %v735_v54 = vmul.f32 %v3141_v48, %v3768_v12 }
  0x88   : > { %778 = vadd.xlane.f32.xlu1 %v777_v60  ;;  %775 = vadd.xlane.f32.xlu0 %v774_v62  ;;  %v3860_v60 = vrot.slane %v3852_v53, %v3838_v40  ;;  %v825_v62 = vsel %vm605_vm0, %v735_v54, 0.0 }
  0x8c   : > { %784 = vadd.xlane.f32.xlu1 %v783_v6  ;;  %781 = vadd.xlane.f32.xlu0 %v780_v8  ;;  %v3869_v6 = vrot.slane %v3860_v60, %v3759_v2  ;;  %v831_v8 = vsel %vm605_vm0, %v737_v63, 0.0 }
  0x8e   : > { %v573_v10 = vmul.f32 %v3020_v5, %v3869_v6  ;;  %v574_v11 = vmul.f32 %v3021_v7, %v3869_v6 }
  0x90   : > { %790 = vadd.xlane.f32.xlu1 %v789_v14  ;;  %787 = vadd.xlane.f32.xlu0 %v786_v16  ;;  %v606_v12 = vsel %vm605_vm0, %v573_v10, 0.0  ;;  %v609_v13 = vsel %vm605_vm0, %v574_v11, 0.0  ;;  %v3877_v14 = vstv %s353_s21 }
  0x94   : > { %796 = vadd.xlane.f32.xlu1 %v795_v19  ;;  %793 = vadd.xlane.f32.xlu0 %v792_v25 }
  0x98   : > { %802 = vadd.xlane.f32.xlu1 %v801_v31  ;;  %799 = vadd.xlane.f32.xlu0 %v798_v33 }
  0x9c   : > { %808 = vadd.xlane.f32.xlu1 %v807_v37  ;;  %805 = vadd.xlane.f32.xlu0 %v804_v42 }
  0xa0   : > { %814 = vadd.xlane.f32.xlu1 %v813_v46  ;;  %811 = vadd.xlane.f32.xlu0 %v810_v50 }
  0xa4   : > { %820 = vadd.xlane.f32.xlu1 %v819_v57  ;;  %817 = vadd.xlane.f32.xlu0 %v816_v58 }
  0xa8   : > { %826 = vadd.xlane.f32.xlu1 %v825_v62  ;;  %823 = vadd.xlane.f32.xlu0 %v822_v4 }
  0xac   : > { %832 = vadd.xlane.f32.xlu1 %v831_v8  ;;  %829 = vadd.xlane.f32.xlu0 %v828_v9 }
  0xb0   : > { %607 = vadd.xlane.f32.xlu0 %v606_v12  ;;  %610 = vadd.xlane.f32.xlu1 %v609_v13 }
  0xfd   : > { %v746_v15 = vpop.xlane.xlu1 %745  ;;  %v740_v16 = vpop.xlane.xlu0 %739 }
  0xfe   : > { %v835_v17 = vadd.f32 %v3877_v14, %v740_v16  ;;  %v837_v32 = vadd.f32 %v3877_v14, %v746_v15 }
 0x100   : > { %1265 = vperm.xlu0 %3246, %v835_v17  }
 0x101   : > { %v749_v18 = vpop.xlane.xlu1 %748  ;;  %v743_v19 = vpop.xlane.xlu0 %742 }
 0x102   : > { %v836_v25 = vadd.f32 %v3877_v14, %v743_v19  ;;  %v838_v41 = vadd.f32 %v3877_v14, %v749_v18 }
 0x105   : > { %v755_v20 = vpop.xlane.xlu1 %754  ;;  %v752_v21 = vpop.xlane.xlu0 %751 }
 0x106   : > { %v839_v22 = vadd.f32 %v3877_v14, %v752_v21  ;;  %v840_v26 = vadd.f32 %v3877_v14, %v755_v20 }
 0x108   : > { %1268 = vperm.xlu1 %3247, %v839_v22  }
 0x109   : > { %v761_v23 = vpop.xlane.xlu1 %760  ;;  %v758_v24 = vpop.xlane.xlu0 %757 }
 0x10a   : > { %v841_v34 = vadd.f32 %v3877_v14, %v758_v24  ;;  %v842_v44 = vadd.f32 %v3877_v14, %v761_v23  ;;  %v499_v24 = vcombine.high %v3852_v53, %v3852_v53  ;;  %v529_v53 = vcombine.high %v3860_v60, %v3860_v60 }
 0x10c   : > { %1289 = vperm.xlu1 %3247, %v836_v25   ;;  %v3146_v25 = vld [vmem:[%s3742_s20 + $0x8] sm:$0xff]  }
 0x10d   : > { %v767_v27 = vpop.xlane.xlu1 %766  ;;  %v764_v28 = vpop.xlane.xlu0 %763 }
 0x10e   : > { %v844_v29 = vadd.f32 %v3877_v14, %v767_v27  ;;  %v843_v48 = vadd.f32 %v3877_v14, %v764_v28  ;;  %v521_v27 = vrot.slane %v499_v24, %v3838_v40  ;;  %v3147_v28 = vld [vmem:[%s3742_s20 + $0x10] sm:$0xff]  }
 0x110   : > { %1292 = vperm.xlu1 %3247, %v840_v26   ;;  %1295 = vperm.xlu0 %3246, %v844_v29   ;;  %v3024_v26 = vunpack.c.l.bf16 %v3146_v25 }
 0x111   : > { %v773_v30 = vpop.xlane.xlu1 %772  ;;  %v770_v31 = vpop.xlane.xlu0 %769 }
 0x112   : > { %v846_v33 = vadd.f32 %v3877_v14, %v773_v30  ;;  %v845_v51 = vadd.f32 %v3877_v14, %v770_v31  ;;  %v575_v29 = vmul.f32 %v3024_v26, %v3869_v6  ;;  %v3028_v30 = vunpack.c.l.bf16 %v3147_v28 }
 0x113   : > { %v540_v31 = vrot.slane %v521_v27, %v3759_v2 }
 0x114   : > { %1313 = vperm.xlu1 %3247, %v837_v32   ;;  %1343 = vperm.xlu0 %3246, %v846_v33   ;;  %v3148_v32 = vld [vmem:[%s3742_s20 + $0x18] sm:$0xff]   ;;  %v612_v33 = vsel %vm605_vm0, %v575_v29, 0.0 }
 0x115   : > { %v779_v35 = vpop.xlane.xlu1 %778  ;;  %v776_v36 = vpop.xlane.xlu0 %775 }
 0x116   : > { %v848_v37 = vadd.f32 %v3877_v14, %v779_v35  ;;  %v847_v56 = vadd.f32 %v3877_v14, %v776_v36  ;;  %v3923_v35 = vld [vmem:[%s3742_s20 + $0x20] sm:$0xff]  }
 0x118   : > { %1316 = vperm.xlu1 %3247, %v841_v34   ;;  %1298 = vperm.xlu0 %3246, %v848_v37   ;;  %v3032_v34 = vunpack.c.l.bf16 %v3148_v32 }
 0x119   : > { %v785_v38 = vpop.xlane.xlu1 %784  ;;  %v782_v39 = vpop.xlane.xlu0 %781 }
 0x11a   : > { %v850_v42 = vadd.f32 %v3877_v14, %v785_v38  ;;  %v849_v61 = vadd.f32 %v3877_v14, %v782_v39  ;;  %v579_v37 = vmul.f32 %v3032_v34, %v540_v31  ;;  %v3036_v38 = vunpack.c.l.bf16 %v3923_v35 }
 0x11b   : > { %v3928_v39 = vrot.slane %v529_v53, %v3759_v2 }
 0x11c   : > { %1337 = vperm.xlu1 %3247, %v838_v41   ;;  %1346 = vperm.xlu0 %3246, %v850_v42   ;;  %v3931_v41 = vld [vmem:[%s3742_s20 + $0x28] sm:$0xff]   ;;  %v531_v42 = vcombine.high %v521_v27, %v521_v27 }
 0x11d   : > { %v791_v43 = vpop.xlane.xlu1 %790  ;;  %v788_v47 = vpop.xlane.xlu0 %787  ;;  %v581_v60 = vmul.f32 %v3036_v38, %v3928_v39 }
 0x11e   : > { %v852_v46 = vadd.f32 %v3877_v14, %v791_v43  ;;  %v851_v3 = vadd.f32 %v3877_v14, %v788_v47  ;;  %v624_v43 = vsel %vm605_vm0, %v579_v37, 0.0  ;;  %v484_v47 = vcombine.high %v3843_v45, %v3843_v45 }
 0x120   : > { %1340 = vperm.xlu1 %3247, %v842_v44   ;;  %1301 = vperm.xlu0 %3246, %v852_v46   ;;  %v3040_v44 = vunpack.c.l.bf16 %v3931_v41  ;;  %v3937_v46 = vld [vmem:[%s3742_s20 + $0x30] sm:$0xff]  }
 0x121   : > { %v797_v49 = vpop.xlane.xlu1 %796  ;;  %v794_v54 = vpop.xlane.xlu0 %793  ;;  %v3045_v37 = vunpack.c.h.bf16 %v3937_v46 }
 0x122   : > { %v854_v50 = vadd.f32 %v3877_v14, %v797_v49  ;;  %v853_v8 = vadd.f32 %v3877_v14, %v794_v54  ;;  %v3943_v49 = vrot.slane %v531_v42, %v3759_v2  ;;  %v3949_v54 = vld [vmem:[%s3742_s20 + $0x38] sm:$0xff]  }
 0x124   : > { %1271 = vperm.xlu1 %3247, %v843_v48   ;;  %1349 = vperm.xlu0 %3246, %v854_v50   ;;  %v3044_v48 = vunpack.c.l.bf16 %v3937_v46  ;;  %v630_v50 = vsel %vm605_vm0, %v581_v60, 0.0 }
 0x125   : > { %v803_v52 = vpop.xlane.xlu1 %802  ;;  %v800_v59 = vpop.xlane.xlu0 %799 }
 0x126   : > { %v856_v55 = vadd.f32 %v3877_v14, %v803_v52  ;;  %v855_v12 = vadd.f32 %v3877_v14, %v800_v59  ;;  %v498_v52 = vrot.slane %v484_v47, %v3838_v40  ;;  %v3956_v59 = vld [vmem:[%s3742_s20 + $0x40] sm:$0xff]   ;;  %v3159_v47 = vld [vmem:[%s3742_s20 + $0x70] sm:$0xff]  }
 0x128   : > { %1319 = vperm.xlu1 %3247, %v845_v51   ;;  %1304 = vperm.xlu0 %3246, %v856_v55   ;;  %v583_v51 = vmul.f32 %v3040_v44, %v3928_v39  ;;  %v585_v55 = vmul.f32 %v3044_v48, %v3943_v49  ;;  %v586_v44 = vmul.f32 %v3045_v37, %v3943_v49  ;;  %v3049_v48 = vunpack.c.h.bf16 %v3949_v54 }
 0x129   : > { %v809_v57 = vpop.xlane.xlu1 %808  ;;  %v806_v5 = vpop.xlane.xlu0 %805 }
 0x12a   : > { %v858_v58 = vadd.f32 %v3877_v14, %v809_v57  ;;  %v857_v16 = vadd.f32 %v3877_v14, %v806_v5  ;;  %v636_v45 = vsel %vm605_vm0, %v583_v51, 0.0  ;;  %v514_v57 = vrot.slane %v498_v52, %v3838_v40 }
 0x12c   : > { %1274 = vperm.xlu1 %3247, %v847_v56   ;;  %1352 = vperm.xlu0 %3246, %v858_v58   ;;  %v3048_v56 = vunpack.c.l.bf16 %v3949_v54  ;;  %v3025_v58 = vunpack.c.h.bf16 %v3146_v25  ;;  %v530_v27 = vcombine.high %v514_v57, %v514_v57 }
 0x12d   : > { %v815_v62 = vpop.xlane.xlu1 %814  ;;  %v812_v11 = vpop.xlane.xlu0 %811 }
 0x12e   : > { %v860_v63 = vadd.f32 %v3877_v14, %v815_v62  ;;  %v859_v18 = vadd.f32 %v3877_v14, %v812_v11  ;;  %v587_v62 = vmul.f32 %v3048_v56, %v3943_v49  ;;  %v576_v5 = vmul.f32 %v3025_v58, %v3869_v6 }
 0x12f   : > { %v560_v34 = vrot.slane %v530_v27, %v3759_v2  ;;  %v3053_v56 = vunpack.c.h.bf16 %v3956_v59 }
 0x130   : > { %1322 = vperm.xlu1 %3247, %v849_v61   ;;  %1307 = vperm.xlu0 %3246, %v860_v63   ;;  %v642_v61 = vsel %vm605_vm0, %v585_v55, 0.0  ;;  %v3052_v63 = vunpack.c.l.bf16 %v3956_v59  ;;  %v3160_v55 = vld [vmem:[%s3742_s20 + $0x78] sm:$0xff]  }
 0x131   : > { %v821_v4 = vpop.xlane.xlu1 %820  ;;  %v818_v17 = vpop.xlane.xlu0 %817  ;;  %v3080_v58 = vunpack.c.l.bf16 %v3160_v55  ;;  %v3081_v27 = vunpack.c.h.bf16 %v3160_v55 }
 0x132   : > { %v862_v7 = vadd.f32 %v3877_v14, %v821_v4  ;;  %v861_v20 = vadd.f32 %v3877_v14, %v818_v17  ;;  %v500_v4 = vcombine.high %v498_v52, %v498_v52  ;;  %v3033_v17 = vunpack.c.h.bf16 %v3148_v32 }
 0x133   : > { %v645_v52 = vsel %vm605_vm0, %v586_v44, 0.0 }
 0x134   : > { %1277 = vperm.xlu1 %3247, %v851_v3   ;;  %1355 = vperm.xlu0 %3246, %v862_v7   ;;  %v3962_v3 = vrot.slane %v514_v57, %v3759_v2  ;;  %v3029_v7 = vunpack.c.h.bf16 %v3147_v28 }
 0x135   : > { %v827_v9 = vpop.xlane.xlu1 %826  ;;  %v824_v19 = vpop.xlane.xlu0 %823 }
 0x136   : > { %v864_v10 = vadd.f32 %v3877_v14, %v827_v9  ;;  %v863_v21 = vadd.f32 %v3877_v14, %v824_v19  ;;  %v648_v9 = vsel %vm605_vm0, %v587_v62, 0.0  ;;  %v590_v62 = vmul.f32 %v3053_v56, %v3962_v3 }
 0x138   : > { %1325 = vperm.xlu1 %3247, %v853_v8   ;;  %1310 = vperm.xlu0 %3246, %v864_v10   ;;  %v3966_v8 = vld [vmem:[%s3742_s20 + $0x48] sm:$0xff]   ;;  %v589_v10 = vmul.f32 %v3052_v63, %v3962_v3  ;;  %v657_v59 = vsel %vm605_vm0, %v590_v62, 0.0 }
 0x139   : > { %v833_v13 = vpop.xlane.xlu1 %832  ;;  %v830_v22 = vpop.xlane.xlu0 %829  ;;  %v3056_v11 = vunpack.c.l.bf16 %v3966_v8  ;;  %v3057_v63 = vunpack.c.h.bf16 %v3966_v8 }
 0x13a   : > { %v866_v15 = vadd.f32 %v3877_v14, %v833_v13  ;;  %v865_v23 = vadd.f32 %v3877_v14, %v830_v22  ;;  %v577_v14 = vmul.f32 %v3028_v30, %v540_v31  ;;  %v615_v13 = vsel %vm605_vm0, %v576_v5, 0.0  ;;  %v3984_v22 = vld [vmem:[%s3742_s20 + $0x58] sm:$0xff]   ;;  %v3993_v30 = vld [vmem:[%s3742_s20 + $0x60] sm:$0xff]  }
 0x13b   : > { %v654_v6 = vsel %vm605_vm0, %v589_v10, 0.0  ;;  %v3064_v26 = vunpack.c.l.bf16 %v3984_v22 }
 0x13c   : > { %1280 = vperm.xlu1 %3247, %v855_v12   ;;  %1358 = vperm.xlu0 %3246, %v866_v15   ;;  %v618_v36 = vsel %vm605_vm0, %v577_v14, 0.0  ;;  %v528_v12 = vrot.slane %v500_v4, %v3838_v40  ;;  %v578_v15 = vmul.f32 %v3029_v7, %v540_v31  ;;  %v3068_v14 = vunpack.c.l.bf16 %v3993_v30 }
 0x13d   : > { %v4019_v4 = vpop.xlane.xlu1 %610  ;;  %v592_v7 = vmul.f32 %v3057_v63, %v3962_v3 }
 0x13e   : > { %v621_v40 = vsel %vm605_vm0, %v578_v15, 0.0 }
 0x13f   : > { %v663_v8 = vsel %vm605_vm0, %v592_v7, 0.0 }
 0x140   : > { %1328 = vperm.xlu1 %3247, %v857_v16   ;;  %v3974_v16 = vld [vmem:[%s3742_s20 + $0x50] sm:$0xff]  }
 0x141   : > { %v3060_v19 = vunpack.c.l.bf16 %v3974_v16 }
 0x144   : > { %1283 = vperm.xlu1 %3247, %v859_v18   ;;  %v591_v18 = vmul.f32 %v3056_v11, %v3962_v3 }
 0x146   : > { %v660_v24 = vsel %vm605_vm0, %v591_v18, 0.0 }
 0x148   : > { %1331 = vperm.xlu1 %3247, %v861_v20   ;;  %v3980_v20 = vrot.slane %v528_v12, %v3759_v2 }
 0x14a   : > { %v593_v25 = vmul.f32 %v3060_v19, %v3980_v20 }
 0x14c   : > { %1286 = vperm.xlu1 %3247, %v863_v21   ;;  %v580_v21 = vmul.f32 %v3033_v17, %v540_v31  ;;  %v3041_v31 = vunpack.c.h.bf16 %v3931_v41  ;;  %v666_v32 = vsel %vm605_vm0, %v593_v25, 0.0  ;;  %v597_v41 = vmul.f32 %v3068_v14, %v560_v34 }
 0x14e   : > { %v627_v28 = vsel %vm605_vm0, %v580_v21, 0.0 }
 0x150   : > { %1334 = vperm.xlu1 %3247, %v865_v23   ;;  %v3037_v23 = vunpack.c.h.bf16 %v3923_v35  ;;  %v584_v35 = vmul.f32 %v3041_v31, %v3928_v39 }
 0x152   : > { %v582_v29 = vmul.f32 %v3037_v23, %v3928_v39  ;;  %v639_v60 = vsel %vm605_vm0, %v584_v35, 0.0  ;;  %v678_v39 = vsel %vm605_vm0, %v597_v41, 0.0 }
 0x154   : > { %v633_v53 = vsel %vm605_vm0, %v582_v29, 0.0 }
 0x15b   : > { %613 = vadd.xlane.f32.xlu0 %v612_v33  ;;  %v595_v33 = vmul.f32 %v3064_v26, %v3980_v20 }
 0x15d   : > { %v672_v38 = vsel %vm605_vm0, %v595_v33, 0.0 }
 0x15f   : > { %619 = vadd.xlane.f32.xlu0 %v618_v36  ;;  %v3158_v36 = vld [vmem:[%s3742_s20 + $0x68] sm:$0xff]  }
 0x160   : > { %v3072_v42 = vunpack.c.l.bf16 %v3158_v36 }
 0x162   : > { %v599_v46 = vmul.f32 %v3072_v42, %v560_v34 }
 0x163   : > { %625 = vadd.xlane.f32.xlu0 %v624_v43  ;;  %v532_v43 = vcombine.high %v528_v12, %v528_v12 }
 0x164   : > { %v684_v57 = vsel %vm605_vm0, %v599_v46, 0.0 }
 0x165   : > { %v564_v51 = vrot.slane %v532_v43, %v3759_v2 }
 0x167   : > { %631 = vadd.xlane.f32.xlu0 %v630_v50  ;;  %v3076_v50 = vunpack.c.l.bf16 %v3159_v47  ;;  %v604_v31 = vmul.f32 %v3081_v27, %v564_v51 }
 0x169   : > { %v601_v54 = vmul.f32 %v3076_v50, %v564_v51  ;;  %v699_v14 = vsel %vm605_vm0, %v604_v31, 0.0 }
 0x16b   : > { %637 = vadd.xlane.f32.xlu0 %v636_v45  ;;  %v588_v45 = vmul.f32 %v3049_v48, %v3943_v49  ;;  %v690_v5 = vsel %vm605_vm0, %v601_v54, 0.0  ;;  %v603_v49 = vmul.f32 %v3080_v58, %v564_v51 }
 0x16d   : > { %v696_v10 = vsel %vm605_vm0, %v603_v49, 0.0 }
 0x16f   : > { %643 = vadd.xlane.f32.xlu0 %v642_v61  ;;  %v651_v61 = vsel %vm605_vm0, %v588_v45, 0.0 }
 0x173   : > { %649 = vadd.xlane.f32.xlu0 %v648_v9  ;;  %v3061_v9 = vunpack.c.h.bf16 %v3974_v16  ;;  %v3069_v16 = vunpack.c.h.bf16 %v3993_v30 }
 0x174   : > { %616 = vadd.xlane.f32.xlu1 %v615_v13  ;;  %v3065_v13 = vunpack.c.h.bf16 %v3984_v22 }
 0x175   : > { %v594_v12 = vmul.f32 %v3061_v9, %v3980_v20  ;;  %v598_v19 = vmul.f32 %v3069_v16, %v560_v34 }
 0x176   : > { %v596_v3 = vmul.f32 %v3065_v13, %v3980_v20 }
 0x177   : > { %655 = vadd.xlane.f32.xlu0 %v654_v6  ;;  %v669_v15 = vsel %vm605_vm0, %v594_v12, 0.0  ;;  %v608_v6 = vpop.xlane.xlu0 %607  ;;  %v681_v22 = vsel %vm605_vm0, %v598_v19, 0.0 }
 0x178   : > { %622 = vadd.xlane.f32.xlu1 %v621_v40  ;;  %v675_v18 = vsel %vm605_vm0, %v596_v3, 0.0  ;;  %v3073_v40 = vunpack.c.h.bf16 %v3158_v36 }
 0x17a   : > { %v600_v23 = vmul.f32 %v3073_v40, %v560_v34 }
 0x17b   : > { %661 = vadd.xlane.f32.xlu0 %v660_v24  ;;  %v3077_v24 = vunpack.c.h.bf16 %v3159_v47 }
 0x17c   : > { %628 = vadd.xlane.f32.xlu1 %v627_v28  ;;  %v687_v20 = vsel %vm605_vm0, %v600_v23, 0.0 }
 0x17d   : > { %v602_v26 = vmul.f32 %v3077_v24, %v564_v51 }
 0x17f   : > { %667 = vadd.xlane.f32.xlu0 %v666_v32  ;;  %v4040_v25 = vpop.permute.xlu0 %1265  ;;  %v693_v30 = vsel %vm605_vm0, %v602_v26, 0.0 }
 0x180   : > { %634 = vadd.xlane.f32.xlu1 %v633_v53 }
 0x183   : > { %673 = vadd.xlane.f32.xlu0 %v672_v38 }
 0x184   : > { %640 = vadd.xlane.f32.xlu1 %v639_v60 }
 0x187   : > { %679 = vadd.xlane.f32.xlu0 %v678_v39  ;;  %v4026_v11 = vpop.permute.xlu1 %1268 }
 0x188   : > { %646 = vadd.xlane.f32.xlu1 %v645_v52 }
 0x18b   : > { %685 = vadd.xlane.f32.xlu0 %v684_v57  ;;  %v4034_v17 = vpop.permute.xlu1 %1289 }
 0x18c   : > { %652 = vadd.xlane.f32.xlu1 %v651_v61 }
 0x18f   : > { %691 = vadd.xlane.f32.xlu0 %v690_v5  ;;  %v4037_v21 = vpop.permute.xlu1 %1292  ;;  %v4043_v28 = vpop.permute.xlu0 %1295 }
 0x190   : > { %658 = vadd.xlane.f32.xlu1 %v657_v59 }
 0x193   : > { %697 = vadd.xlane.f32.xlu0 %v696_v10  ;;  %v4045_v29 = vpop.permute.xlu1 %1313  ;;  %v4048_v32 = vpop.permute.xlu0 %1343 }
 0x194   : > { %664 = vadd.xlane.f32.xlu1 %v663_v8  ;;  %v4099_v8 = vand.u32 127, %v488_v0 }
 0x196   : > { %v4103_v12 = vsub.s32 %v4099_v8, %v3756_v1 }
 0x197   : > { %v4050_v33 = vpop.permute.xlu1 %1316  ;;  %v4053_v34 = vpop.permute.xlu0 %1298 }
 0x198   : > { %670 = vadd.xlane.f32.xlu1 %v669_v15  ;;  %v1399_v16 = vrot.slane %v4037_v21, %v4103_v12  ;;  %v1403_v19 = vrot.slane %v4043_v28, %v4103_v12  ;;  %v1407_v23 = vrot.slane %v4053_v34, %v4103_v12  ;;  %v1363_v24 = vrot.slane %v4040_v25, %v4103_v12 }
 0x199   : > { %v1427_v27 = vrot.slane %v4045_v29, %v4103_v12 }
 0x19b   : > { %v1338_v53 = vpop.permute.xlu1 %1337  ;;  %v4055_v35 = vpop.permute.xlu0 %1346 }
 0x19c   : > { %676 = vadd.xlane.f32.xlu1 %v675_v18  ;;  %v1459_v0 = vrot.slane %v1338_v53, %v4103_v12  ;;  %v1367_v18 = vrot.slane %v4026_v11, %v4103_v12  ;;  %v1471_v25 = vrot.slane %v4055_v35, %v4103_v12 }
 0x19f   : > { %v1341_v36 = vpop.permute.xlu1 %1340  ;;  %v4057_v37 = vpop.permute.xlu0 %1301 }
 0x1a0   : > { %682 = vadd.xlane.f32.xlu1 %v681_v22  ;;  %v1463_v3 = vrot.slane %v1341_v36, %v4103_v12  ;;  %v1467_v22 = vrot.slane %v4048_v32, %v4103_v12  ;;  %v1488_v32 = vsel %vm1125_vm1, %v1367_v18, %v1363_v24  ;;  %v1411_v53 = vrot.slane %v4057_v37, %v4103_v12 }
 0x1a1   : > { %v3537_v18 = vmov 1934713408  }
 0x1a2   : > { %v1509_v40 = vsel %vm1125_vm1, %v1463_v3, %v1459_v0 }
 0x1a3   : > { %v4059_v38 = vpop.permute.xlu1 %1271  ;;  %v4061_v41 = vpop.permute.xlu0 %1349  ;;  %v1510_v28 = vsel %vm1127_vm2, %v1467_v22, %v1509_v40 }
 0x1a4   : > { %688 = vadd.xlane.f32.xlu1 %v687_v20  ;;  %v3536_v20 = vmov 1983009808  }
 0x1a5   : > { %v1167_v26 = vunpack.c.l.s4 %v3536_v20 }
 0x1a7   : > { %v4063_v42 = vpop.permute.xlu1 %1319  ;;  %v4065_v43 = vpop.permute.xlu0 %1304 }
 0x1a8   : > { %694 = vadd.xlane.f32.xlu1 %v693_v30  ;;  %v1371_v30 = vrot.slane %v4059_v38, %v4103_v12  ;;  %v1435_v31 = vrot.slane %v4063_v42, %v4103_v12  ;;  %v1511_v38 = vsel %vm1129_vm3, %v1471_v25, %v1510_v28  ;;  %v1475_v42 = vrot.slane %v4061_v41, %v4103_v12 }
 0x1a9   : > { %900 = vperm.xlu0 %3246, %v608_v6   ;;  %v1395_v6 = vrot.slane %v4034_v17, %v4103_v12  ;;  %v1431_v17 = vrot.slane %v4050_v33, %v4103_v12 }
 0x1ab   : > { %v4067_v60 = vpop.permute.xlu1 %1274  ;;  %v4069_v44 = vpop.permute.xlu0 %1352  ;;  %v1495_v21 = vsel %vm1125_vm1, %v1399_v16, %v1395_v6  ;;  %v1502_v29 = vsel %vm1125_vm1, %v1431_v17, %v1427_v27 }
 0x1ac   : > { %700 = vadd.xlane.f32.xlu1 %v699_v14  ;;  %v1496_v33 = vsel %vm1127_vm2, %v1403_v19, %v1495_v21  ;;  %v1375_v35 = vrot.slane %v4067_v60, %v4103_v12  ;;  %v1199_v19 = vunpack.c.l.s4 %v3537_v18 }
 0x1ad   : > { %v1497_v34 = vsel %vm1129_vm3, %v1407_v23, %v1496_v33 }
 0x1af   : > { %v4071_v47 = vpop.permute.xlu1 %1322  ;;  %v4073_v48 = vpop.permute.xlu0 %1307 }
 0x1b0   : > { %v1439_v14 = vrot.slane %v4071_v47, %v4103_v12 }
 0x1b3   : > { %v4075_v39 = vpop.permute.xlu1 %1277  ;;  %v4077_v46 = vpop.permute.xlu0 %1355 }
 0x1b4   : > { %v1379_v37 = vrot.slane %v4075_v39, %v4103_v12  ;;  %v1483_v39 = vrot.slane %v4077_v46, %v4103_v12  ;;  %v1419_v46 = vrot.slane %v4073_v48, %v4103_v12 }
 0x1b7   : > { %v4079_v50 = vpop.permute.xlu1 %1325  ;;  %v4081_v51 = vpop.permute.xlu0 %1310 }
 0x1b8   : > { %v1443_v36 = vrot.slane %v4079_v50, %v4103_v12 }
 0x1bb   : > { %v4083_v52 = vpop.permute.xlu1 %1280  ;;  %v4085_v55 = vpop.permute.xlu0 %1358 }
 0x1bc   : > { %v1383_v60 = vrot.slane %v4083_v52, %v4103_v12 }
 0x1bf   : > { %v4087_v45 = vpop.permute.xlu1 %1328 }
 0x1c0   : > { %v1447_v47 = vrot.slane %v4087_v45, %v4103_v12 }
 0x1c3   : > { %v4089_v57 = vpop.permute.xlu1 %1283 }
 0x1c7   : > { %v4091_v58 = vpop.permute.xlu1 %1331 }
 0x1c8   : > { %v1451_v50 = vrot.slane %v4091_v58, %v4103_v12  ;;  %v1387_v58 = vrot.slane %v4089_v57, %v4103_v12 }
 0x1cb   : > { %v4094_v61 = vpop.permute.xlu1 %1286 }
 0x1cf   : > { %v4096_v63 = vpop.permute.xlu1 %1334 }
 0x1d0   : > { %v1455_v45 = vrot.slane %v4096_v63, %v4103_v12  ;;  %v1391_v63 = vrot.slane %v4094_v61, %v4103_v12  ;;  %v1498_v61 = vsel %vm1131_vm4, %v1411_v53, %v1497_v34  ;;  %v5166_v34 = vmov 0.0  }
 0x1e8   : > { %v614_v56 = vpop.xlane.xlu0 %613 }
 0x1ec   : > { %v620_v54 = vpop.xlane.xlu0 %619 }
 0x1ed   : > { %903 = vperm.xlu1 %3247, %v620_v54   ;;  %v1503_v54 = vsel %vm1127_vm2, %v1435_v31, %v1502_v29 }
 0x1ee   : > { %v1504_v41 = vsel %vm1129_vm3, %v1439_v14, %v1503_v54 }
 0x1f0   : > { %v626_v62 = vpop.xlane.xlu0 %625 }
 0x1f1   : > { %924 = vperm.xlu1 %3247, %v4019_v4  }
 0x1f4   : > { %v632_v5 = vpop.xlane.xlu0 %631 }
 0x1f5   : > { %948 = vperm.xlu1 %3247, %v614_v56   ;;  %v1489_v56 = vsel %vm1127_vm2, %v1371_v30, %v1488_v32 }
 0x1f8   : > { %v638_v59 = vpop.xlane.xlu0 %637 }
 0x1fc   : > { %v644_v10 = vpop.xlane.xlu0 %643 }
 0x200   : > { %v650_v13 = vpop.xlane.xlu0 %649 }
 0x201   : > { %v617_v49 = vpop.xlane.xlu1 %616 }
 0x202   : > { %972 = vperm.xlu1 %3247, %v617_v49   ;;  %v1505_v49 = vsel %vm1131_vm4, %v1443_v36, %v1504_v41 }
 0x203   : > { %v1506_v52 = vsel %vm1133_vm5, %v1447_v47, %v1505_v49 }
 0x205   : > { %v623_v7 = vpop.xlane.xlu1 %622 }
 0x206   : > { %906 = vperm.xlu1 %3247, %v632_v5   ;;  %927 = vperm.xlu0 %3246, %v623_v7   ;;  %v1415_v5 = vrot.slane %v4065_v43, %v4103_v12  ;;  %v1512_v43 = vsel %vm1131_vm4, %v1475_v42, %v1511_v38 }
 0x208   : > { %v1499_v3 = vsel %vm1133_vm5, %v1415_v5, %v1498_v61 }
 0x209   : > { %v629_v9 = vpop.xlane.xlu1 %628  ;;  %v1500_v6 = vsel %vm1135_vm6, %v1419_v46, %v1499_v3 }
 0x20a   : > { %954 = vperm.xlu1 %3247, %v638_v59   ;;  %951 = vperm.xlu0 %3246, %v626_v62   ;;  %v1479_v62 = vrot.slane %v4069_v44, %v4103_v12  ;;  %v1490_v44 = vsel %vm1129_vm3, %v1375_v35, %v1489_v56  ;;  %v1487_v59 = vrot.slane %v4085_v55, %v4103_v12 }
 0x20b   : > { %v1491_v7 = vsel %vm1131_vm4, %v1379_v37, %v1490_v44 }
 0x20c   : > { %v1513_v57 = vsel %vm1133_vm5, %v1479_v62, %v1512_v43  ;;  %v1492_v55 = vsel %vm1133_vm5, %v1383_v60, %v1491_v7 }
 0x20d   : > { %v635_v4 = vpop.xlane.xlu1 %634  ;;  %v1493_v48 = vsel %vm1135_vm6, %v1387_v58, %v1492_v55 }
 0x20e   : > { %909 = vperm.xlu1 %3247, %v644_v10   ;;  %975 = vperm.xlu0 %3246, %v629_v9   ;;  %v1507_v9 = vsel %vm1135_vm6, %v1451_v50, %v1506_v52  ;;  %v1423_v10 = vrot.slane %v4081_v51, %v4103_v12  ;;  %v1494_v0 = vsel %vm1137_vm7, %v1391_v63, %v1493_v48 }
 0x210   : > { %v1501_v40 = vsel %vm1137_vm7, %v1423_v10, %v1500_v6 }
 0x211   : > { %v641_v15 = vpop.xlane.xlu1 %640 }
 0x212   : > { %957 = vperm.xlu1 %3247, %v650_v13   ;;  %930 = vperm.xlu0 %3246, %v635_v4   ;;  %v1508_v4 = vsel %vm1137_vm7, %v1455_v45, %v1507_v9  ;;  %v1514_v13 = vsel %vm1135_vm6, %v1483_v39, %v1513_v57  ;;  %v656_v45 = vpop.xlane.xlu0 %655 }
 0x213   : > { %v1515_v16 = vsel %vm1137_vm7, %v1487_v59, %v1514_v13  ;;  %v1520_v51 = vcombine.low %v1494_v0, %v1508_v4  ;;  %v1521_v17 = vcombine.high %v1494_v0, %v1508_v4 }
 0x214   : > { %v1536_v22 = vcombine.low %v1501_v40, %v1515_v16  ;;  %v1537_v24 = vcombine.high %v1501_v40, %v1515_v16 }
 0x215   : > { %v647_v11 = vpop.xlane.xlu1 %646 }
 0x216   : > { %978 = vperm.xlu0 %3246, %v641_v15   ;;  %v1168_v15 = vunpack.c.0.s8 %v1167_v26  ;;  %v662_v5 = vpop.xlane.xlu0 %661 }
 0x218   : > { %v4196_v21 = vsub.s32 %v1168_v15, %v3756_v1 }
 0x219   : > { %v653_v39 = vpop.xlane.xlu1 %652 }
 0x21a   : > { %933 = vperm.xlu0 %3246, %v647_v11   ;;  %v1528_v23 = vrot.slane %v1520_v51, %v4196_v21  ;;  %v1200_v11 = vunpack.c.0.s8 %v1199_v19  ;;  %v1544_v20 = vrot.slane %v1536_v22, %v4196_v21  ;;  %v1535_v26 = vrot.slane %v1521_v17, %v4196_v21  ;;  %v668_v49 = vpop.xlane.xlu0 %667 }
 0x21b   : > { %v1551_v31 = vrot.slane %v1537_v24, %v4196_v21 }
 0x21c   : > { %v1552_v27 = vcombine.low %v1528_v23, %v1544_v20  ;;  %v1553_v28 = vcombine.high %v1528_v23, %v1544_v20  ;;  %v4202_v30 = vsub.s32 %v1200_v11, %v3756_v1 }
 0x21d   : > { %v1568_v32 = vcombine.low %v1535_v26, %v1551_v31  ;;  %v1569_v14 = vcombine.high %v1535_v26, %v1551_v31  ;;  %v659_v58 = vpop.xlane.xlu1 %658 }
 0x21e   : > { %v4206_v33 = vrot.slane %v1552_v27, %v4202_v30  ;;  %v4209_v25 = vrot.slane %v1553_v28, %v4202_v30  ;;  %v674_v44 = vpop.xlane.xlu0 %673 }
 0x21f   : > { %v4218_v36 = vrot.slane %v1568_v32, %v4202_v30  ;;  %v4229_v47 = vrot.slane %v1569_v14, %v4202_v30 }
 0x220   : > { %5202 = vst [vmem:[#allocation13_spill] sm:$0xff] %v4209_v25  ;;  %v1589_v29 = vsel %vm1588_vm8, %v4206_v33, -inf  ;;  %v4215_v53 = vcombine.high %v4209_v25, %v5166_v34  ;;  %v1595_v38 = vsel %vm1588_vm8, %v4209_v25, -inf  ;;  %v4243_v62 = vcombine.high %v4206_v33, %v5166_v34 }
 0x221   : > { %5204 = vst [vmem:[#allocation15_spill] sm:$0xff] %v4218_v36  ;;  %v4226_v35 = vcombine.high %v4218_v36, %v5166_v34  ;;  %5206 = vst [vmem:[#allocation17_spill] sm:$0xff] %v4229_v47  ;;  %v1601_v56 = vsel %vm1588_vm8, %v4218_v36, -inf  ;;  %v4237_v37 = vcombine.high %v4229_v47, %v5166_v34  ;;  %v1607_v50 = vsel %vm1588_vm8, %v4229_v47, -inf  ;;  %v665_v59 = vpop.xlane.xlu1 %664 }
 0x222   : > { %5203 = vst [vmem:[#allocation14_spill] sm:$0xff] %v4215_v53  ;;  %v1598_v42 = vsel %vm1588_vm8, %v4215_v53, -inf  ;;  %5208 = vst [vmem:[#allocation19_spill] sm:$0xff] %v4243_v62  ;;  %v1592_v60 = vsel %vm1588_vm8, %v4243_v62, -inf  ;;  %v4253_v7 = vpop.xlane.xlu0 %679 }
 0x223   : > { %5205 = vst [vmem:[#allocation16_spill] sm:$0xff] %v4226_v35  ;;  %v1604_v54 = vsel %vm1588_vm8, %v4226_v35, -inf  ;;  %5207 = vst [vmem:[#allocation18_spill] sm:$0xff] %v4237_v37  ;;  %v1610_v41 = vsel %vm1588_vm8, %v4237_v37, -inf }
 0x225   : > { %v671_v52 = vpop.xlane.xlu1 %670 }
 0x226   : > { %v4257_v57 = vpop.xlane.xlu0 %685 }
 0x229   : > { %v677_v63 = vpop.xlane.xlu1 %676 }
 0x22a   : > { %v4261_v55 = vpop.xlane.xlu0 %691 }
 0x22d   : > { %v4249_v43 = vpop.xlane.xlu1 %682 }
 0x22e   : > { %v4265_v61 = vpop.xlane.xlu0 %697 }
 0x231   : > { %v4251_v46 = vpop.xlane.xlu1 %688 }
 0x232   : > { %v4269_v15 = vpop.permute.xlu0 %900 }
 0x235   : > { %v4255_v9 = vpop.xlane.xlu1 %694 }
 0x236   : > { %1590 = vmax.xlane.f32.xlu1 %v1589_v29 }
 0x239   : > { %1596 = vmax.xlane.f32.xlu0 %v1595_v38  ;;  %v4259_v10 = vpop.xlane.xlu1 %700 }
 0x23a   : > { %1599 = vmax.xlane.f32.xlu1 %v1598_v42 }
 0x23d   : > { %1602 = vmax.xlane.f32.xlu0 %v1601_v56 }
 0x23e   : > { %1605 = vmax.xlane.f32.xlu1 %v1604_v54 }
 0x241   : > { %1608 = vmax.xlane.f32.xlu0 %v1607_v50 }
 0x242   : > { %1611 = vmax.xlane.f32.xlu1 %v1610_v41 }
 0x245   : > { %1593 = vmax.xlane.f32.xlu0 %v1592_v60 }
 0x253   : > { %912 = vperm.xlu1 %3247, %v656_v45  }
 0x257   : > { %960 = vperm.xlu1 %3247, %v662_v5  }
 0x25b   : > { %915 = vperm.xlu1 %3247, %v668_v49   ;;  %981 = vperm.xlu0 %3246, %v653_v39  }
 0x25f   : > { %963 = vperm.xlu1 %3247, %v674_v44   ;;  %936 = vperm.xlu0 %3246, %v659_v58  }
 0x263   : > { %984 = vperm.xlu0 %3246, %v665_v59  }
 0x267   : > { %939 = vperm.xlu0 %3246, %v671_v52  }
 0x26b   : > { %987 = vperm.xlu0 %3246, %v677_v63  }
 0x26c   : > { %v4263_v4 = vpop.permute.xlu1 %903 }
 0x270   : > { %v4267_v13 = vpop.permute.xlu1 %924 }
 0x274   : > { %v4271_v48 = vpop.permute.xlu1 %948 }
 0x281   : > { %v4275_v16 = vpop.permute.xlu1 %972 }
 0x285   : > { %v4273_v3 = vpop.permute.xlu0 %927  ;;  %v4279_v6 = vpop.permute.xlu1 %906 }
 0x289   : > { %v4277_v0 = vpop.permute.xlu0 %951  ;;  %v4283_v18 = vpop.permute.xlu1 %954 }
 0x28d   : > { %v4281_v51 = vpop.permute.xlu0 %975  ;;  %v4287_v40 = vpop.permute.xlu1 %909 }
 0x291   : > { %v4285_v19 = vpop.permute.xlu0 %930  ;;  %v4291_v17 = vpop.permute.xlu1 %957 }
 0x295   : > { %v4289_v22 = vpop.permute.xlu0 %978 }
 0x299   : > { %v4293_v23 = vpop.permute.xlu0 %933 }
 0x2c3   : > { %v4295_v11 = vpop.xlane.xlu1 %1590 }
 0x2c4   : > { %vm1637_vm9 = vcmp.eq.f32.partialorder %v4206_v33, %v4295_v11 }
 0x2c5   : > { %v1645_v24 = vsel %vm1637_vm9, %v4099_v8, 8 }
 0x2c6   : > { %v4300_v20 = vpop.xlane.xlu0 %1596  ;;  %v4303_v26 = vsel %vm1588_vm8, %v1645_v24, 2147483647 }
 0x2c7   : > { %v1655_v27 = vshra.s32 %v4303_v26, 16  ;;  %vm1639_vm10 = vcmp.eq.f32.partialorder %v4209_v25, %v4300_v20  ;;  %v4309_v31 = vpop.xlane.xlu1 %1599 }
 0x2c8   : > { %v1647_v28 = vsel %vm1639_vm10, %v4099_v8, 8  ;;  %vm1640_vm13 = vcmp.eq.f32.partialorder %v4215_v53, %v4309_v31 }
 0x2c9   : > { %v4311_v32 = vcvt.s32.f32 %v1655_v27  ;;  %v4314_v14 = vsel %vm1588_vm8, %v1647_v28, 2147483647  ;;  %v1648_v44 = vsel %vm1640_vm13, %v4099_v8, 8 }
 0x2ca   : > { %v4316_v29 = vpop.xlane.xlu0 %1602  ;;  %v1685_v38 = vshra.s32 %v4314_v14, 16  ;;  %v1698_v27 = vsel %vm1588_vm8, %v1648_v44, 2147483647 }
 0x2cb   : > { %1658 = vmin.xlane.f32.xlu0 %v4311_v32  ;;  %vm1641_vm11 = vcmp.eq.f32.partialorder %v4218_v36, %v4316_v29  ;;  %v4330_v41 = vpop.xlane.xlu1 %1605 }
 0x2cc   : > { %v4322_v42 = vcvt.s32.f32 %v1685_v38  ;;  %v1649_v56 = vsel %vm1641_vm11, %v4099_v8, 8  ;;  %vm1642_vm15 = vcmp.eq.f32.partialorder %v4226_v35, %v4330_v41 }
 0x2cd   : > { %v4328_v50 = vsel %vm1588_vm8, %v1649_v56, 2147483647  ;;  %v1650_v38 = vsel %vm1642_vm15, %v4099_v8, 8 }
 0x2ce   : > { %v4325_v54 = vpop.xlane.xlu0 %1608  ;;  %v1715_v60 = vshra.s32 %v4328_v50, 16 }
 0x2cf   : > { %1688 = vmin.xlane.f32.xlu0 %v4322_v42  ;;  %vm1643_vm12 = vcmp.eq.f32.partialorder %v4229_v47, %v4325_v54  ;;  %v4353_v59 = vpop.xlane.xlu1 %1611 }
 0x2d0   : > { %v4338_v45 = vcvt.s32.f32 %v1715_v60  ;;  %v1651_v5 = vsel %vm1643_vm12, %v4099_v8, 8  ;;  %vm1644_vm0 = vcmp.eq.f32.partialorder %v4237_v37, %v4353_v59  ;;  %v1700_v60 = vshra.s32 %v1698_v27, 16 }
 0x2d1   : > { %v4344_v49 = vsel %vm1588_vm8, %v1651_v5, 2147483647  ;;  %v4365_v5 = vsel %vm1588_vm8, %v1650_v38, 2147483647 }
 0x2d2   : > { %v4341_v39 = vpop.xlane.xlu0 %1593  ;;  %v1745_v58 = vshra.s32 %v4344_v49, 16  ;;  %v1702_v34 = vcvt.s32.f32 %v1700_v60  ;;  %v1729_v25 = vand.u32 65535, %v4365_v5 }
 0x2d3   : > { %1718 = vmin.xlane.f32.xlu0 %v4338_v45  ;;  %vm1638_vm14 = vcmp.eq.f32.partialorder %v4243_v62, %v4341_v39 }
 0x2d4   : > { %v4355_v52 = vcvt.s32.f32 %v1745_v58  ;;  %v1646_v63 = vsel %vm1638_vm14, %v4099_v8, 8  ;;  %v1652_v58 = vsel %vm1644_vm0, %v4099_v8, 8 }
 0x2d5   : > { %v1668_v24 = vsel %vm1588_vm8, %v1646_v63, 2147483647  ;;  %v1730_v63 = vshra.s32 %v4365_v5, 16  ;;  %v4370_v44 = vsel %vm1588_vm8, %v1652_v58, 2147483647 }
 0x2d6   : > { %v1670_v28 = vshra.s32 %v1668_v24, 16  ;;  %v1760_v36 = vshra.s32 %v4370_v44, 16 }
 0x2d7   : > { %1748 = vmin.xlane.f32.xlu0 %v4355_v52  ;;  %v1732_v47 = vcvt.s32.f32 %v1730_v63 }
 0x2d8   : > { %v1672_v56 = vcvt.s32.f32 %v1670_v28  ;;  %v4373_v62 = vcvt.s32.f32 %v1760_v36 }
 0x2da   : > { %1673 = vmin.xlane.f32.xlu1 %v1672_v56  ;;  %v4384_v36 = vpop.permute.xlu0 %981 }
 0x2de   : > { %1703 = vmin.xlane.f32.xlu1 %v1702_v34  ;;  %v4386_v28 = vpop.permute.xlu0 %936 }
 0x2e2   : > { %1733 = vmin.xlane.f32.xlu1 %v1732_v47  ;;  %v4388_v38 = vpop.permute.xlu0 %984 }
 0x2e6   : > { %1763 = vmin.xlane.f32.xlu1 %v4373_v62 }
 0x2ed   : > { %942 = vperm.xlu0 %3246, %v4249_v43   ;;  %v4390_v43 = vpop.permute.xlu0 %939 }
 0x2f1   : > { %990 = vperm.xlu0 %3246, %v4251_v46   ;;  %v4392_v46 = vpop.permute.xlu1 %912 }
 0x2f5   : > { %945 = vperm.xlu0 %3246, %v4255_v9   ;;  %v4394_v9 = vpop.permute.xlu0 %987 }
 0x2f7   : > { %918 = vperm.xlu1 %3247, %v4253_v7   ;;  %v1654_v7 = vand.u32 65535, %v4303_v26 }
 0x2f9   : > { %993 = vperm.xlu0 %3246, %v4259_v10   ;;  %v4397_v10 = vpop.permute.xlu1 %960 }
 0x2fb   : > { %966 = vperm.xlu1 %3247, %v4257_v57  }
 0x2fd   : > { %v4408_v37 = vpop.permute.xlu1 %915 }
 0x2ff   : > { %921 = vperm.xlu1 %3247, %v4261_v55   ;;  %v1656_v55 = vcvt.s32.f32 %v1654_v7  ;;  %v1669_v7 = vand.u32 65535, %v1668_v24 }
 0x301   : > { %v4410_v35 = vpop.permute.xlu1 %963 }
 0x303   : > { %969 = vperm.xlu1 %3247, %v4265_v61   ;;  %v1684_v61 = vand.u32 65535, %v4314_v14 }
 0x305   : > { %v1686_v63 = vcvt.s32.f32 %v1684_v61 }
 0x358   : > { %v4399_v57 = vpop.xlane.xlu0 %1658 }
 0x359   : > { %vm1660_vm9 = vcmp.eq.f32.partialorder %v4311_v32, %v4399_v57  ;;  %v1671_v32 = vcvt.s32.f32 %v1669_v7  ;;  %v1744_v7 = vand.u32 65535, %v4344_v49 }
 0x35a   : > { %v1661_v60 = vsel %vm1660_vm9, %v1656_v55, inf  ;;  %v1699_v55 = vand.u32 65535, %v1698_v27 }
 0x35b   : > { %1662 = vmin.xlane.f32.xlu1 %v1661_v60  ;;  %v1714_v60 = vand.u32 65535, %v4328_v50 }
 0x35c   : > { %v4404_v58 = vpop.xlane.xlu0 %1688  ;;  %v1701_v24 = vcvt.s32.f32 %v1699_v55  ;;  %v1759_v55 = vand.u32 65535, %v4370_v44 }
 0x35d   : > { %vm1690_vm10 = vcmp.eq.f32.partialorder %v4322_v42, %v4404_v58 }
 0x35e   : > { %v1691_v26 = vsel %vm1690_vm10, %v1686_v63, inf  ;;  %v1761_v49 = vcvt.s32.f32 %v1759_v55 }
 0x35f   : > { %1692 = vmin.xlane.f32.xlu0 %v1691_v26  ;;  %v1716_v26 = vcvt.s32.f32 %v1714_v60 }
 0x360   : > { %v4412_v53 = vpop.xlane.xlu0 %1718 }
 0x361   : > { %vm1720_vm12 = vcmp.eq.f32.partialorder %v4338_v45, %v4412_v53 }
 0x362   : > { %v1721_v27 = vsel %vm1720_vm12, %v1716_v26, inf  ;;  %v1004_v26 = vrot.slane %v4263_v4, %v4103_v12  ;;  %v1012_v4 = vrot.slane %v4287_v40, %v4103_v12  ;;  %v1096_v40 = vrot.slane %v4275_v16, %v4103_v12 }
 0x364   : > { %v4420_v42 = vpop.xlane.xlu0 %1748 }
 0x365   : > { %vm1750_vm14 = vcmp.eq.f32.partialorder %v4355_v52, %v4420_v42 }
 0x367   : > { %v4414_v14 = vpop.xlane.xlu1 %1673 }
 0x368   : > { %vm1675_vm11 = vcmp.eq.f32.partialorder %v1672_v56, %v4414_v14  ;;  %v1731_v56 = vcvt.s32.f32 %v1729_v25 }
 0x369   : > { %v1676_v61 = vsel %vm1675_vm11, %v1671_v32, inf  ;;  %v1746_v32 = vcvt.s32.f32 %v1744_v7 }
 0x36a   : > { %1677 = vmin.xlane.f32.xlu0 %v1676_v61 }
 0x36b   : > { %v4422_v63 = vpop.xlane.xlu1 %1703  ;;  %v1751_v60 = vsel %vm1750_vm14, %v1746_v32, inf  ;;  %v1032_v32 = vrot.slane %v4267_v13, %v4103_v12  ;;  %v1104_v13 = vrot.slane %v4289_v22, %v4103_v12 }
 0x36c   : > { %vm1705_vm13 = vcmp.eq.f32.partialorder %v1702_v34, %v4422_v63  ;;  %v4439_v25 = vpop.permute.xlu0 %942 }
 0x36d   : > { %v1706_v50 = vsel %vm1705_vm13, %v1701_v24, inf }
 0x36e   : > { %1707 = vmin.xlane.f32.xlu1 %v1706_v50  ;;  %1722 = vmin.xlane.f32.xlu0 %v1721_v27  ;;  %v1000_v50 = vrot.slane %v4269_v15, %v4103_v12  ;;  %v1008_v27 = vrot.slane %v4279_v6, %v4103_v12  ;;  %v1100_v15 = vrot.slane %v4281_v51, %v4103_v12 }
 0x36f   : > { %v4429_v45 = vpop.xlane.xlu1 %1733  ;;  %v1076_v6 = vrot.slane %v4291_v17, %v4103_v12  ;;  %v1044_v51 = vrot.slane %v4293_v23, %v4103_v12  ;;  %v1080_v17 = vrot.slane %v4397_v10, %v4103_v12 }
 0x370   : > { %vm1735_vm15 = vcmp.eq.f32.partialorder %v1732_v47, %v4429_v45  ;;  %v991_v44 = vpop.permute.xlu0 %990  ;;  %v1068_v47 = vrot.slane %v4277_v0, %v4103_v12  ;;  %v1072_v0 = vrot.slane %v4283_v18, %v4103_v12  ;;  %v1126_v18 = vsel %vm1125_vm1, %v1004_v26, %v1000_v50 }
 0x371   : > { %v1736_v5 = vsel %vm1735_vm15, %v1731_v56, inf  ;;  %v1036_v56 = vrot.slane %v4273_v3, %v4103_v12  ;;  %v1040_v3 = vrot.slane %v4285_v19, %v4103_v12  ;;  %v1084_v50 = vrot.slane %v4410_v35, %v4103_v12 }
 0x372   : > { %1737 = vmin.xlane.f32.xlu1 %v1736_v5  ;;  %1752 = vmin.xlane.f32.xlu0 %v1751_v60  ;;  %v1128_v5 = vsel %vm1127_vm2, %v1008_v27, %v1126_v18  ;;  %v1112_v27 = vrot.slane %v4388_v38, %v4103_v12  ;;  %v1120_v38 = vrot.slane %v991_v44, %v4103_v12 }
 0x373   : > { %v4433_v34 = vpop.xlane.xlu1 %1763  ;;  %v1139_v60 = vsel %vm1125_vm1, %v1036_v56, %v1032_v32  ;;  %v1130_v19 = vsel %vm1129_vm3, %v1012_v4, %v1128_v5  ;;  %v1116_v4 = vrot.slane %v4394_v9, %v4103_v12 }
 0x374   : > { %vm1765_vm0 = vcmp.eq.f32.partialorder %v4373_v62, %v4433_v34  ;;  %v1064_v62 = vrot.slane %v4271_v48, %v4103_v12  ;;  %v946_v55 = vpop.permute.xlu0 %945  ;;  %v1140_v23 = vsel %vm1127_vm2, %v1040_v3, %v1139_v60 }
 0x375   : > { %v1766_v52 = vsel %vm1765_vm0, %v1761_v49, inf  ;;  %v1153_v49 = vsel %vm1125_vm1, %v1100_v15, %v1096_v40  ;;  %v1141_v10 = vsel %vm1129_vm3, %v1044_v51, %v1140_v23  ;;  %v1060_v40 = vrot.slane %v946_v55, %v4103_v12 }
 0x376   : > { %1767 = vmin.xlane.f32.xlu1 %v1766_v52  ;;  %v1146_v48 = vsel %vm1125_vm1, %v1068_v47, %v1064_v62  ;;  %v1108_v52 = vrot.slane %v4384_v36, %v4103_v12  ;;  %v1154_v26 = vsel %vm1127_vm2, %v1104_v13, %v1153_v49  ;;  %v1016_v62 = vrot.slane %v4392_v46, %v4103_v12 }
 0x377   : > { %v4437_v61 = vpop.permute.xlu1 %918  ;;  %v1147_v22 = vsel %vm1127_vm2, %v1072_v0, %v1146_v48  ;;  %v1020_v0 = vrot.slane %v4408_v37, %v4103_v12  ;;  %v1048_v46 = vrot.slane %v4386_v28, %v4103_v12  ;;  %v1052_v37 = vrot.slane %v4390_v43, %v4103_v12 }
 0x378   : > { %v1148_v47 = vsel %vm1129_vm3, %v1076_v6, %v1147_v22  ;;  %v994_v56 = vpop.permute.xlu0 %993  ;;  %v1155_v15 = vsel %vm1129_vm3, %v1108_v52, %v1154_v26  ;;  %v1132_v3 = vsel %vm1131_vm4, %v1016_v62, %v1130_v19  ;;  %v1056_v28 = vrot.slane %v4439_v25, %v4103_v12 }
 0x379   : > { %v1149_v32 = vsel %vm1131_vm4, %v1080_v17, %v1148_v47  ;;  %v1124_v6 = vrot.slane %v994_v56, %v4103_v12  ;;  %v1156_v13 = vsel %vm1131_vm4, %v1112_v27, %v1155_v15  ;;  %v1142_v51 = vsel %vm1131_vm4, %v1048_v46, %v1141_v10 }
 0x37a   : > { %v1150_v48 = vsel %vm1133_vm5, %v1084_v50, %v1149_v32  ;;  %v1157_v18 = vsel %vm1133_vm5, %v1116_v4, %v1156_v13  ;;  %v1143_v60 = vsel %vm1133_vm5, %v1052_v37, %v1142_v51  ;;  %v1695_v10 = vcvt.f32.s32 %v4404_v58 }
 0x37b   : > { %v967_v24 = vpop.permute.xlu1 %966  ;;  %v1144_v19 = vsel %vm1135_vm6, %v1056_v28, %v1143_v60  ;;  %v2042_v58 = vrot.slane %v4295_v11, %v4103_v12  ;;  %v2050_v37 = vrot.slane %v4300_v20, %v4103_v12  ;;  %v2054_v28 = vrot.slane %v4309_v31, %v4103_v12 }
 0x37c   : > { %v1088_v36 = vrot.slane %v967_v24, %v4103_v12  ;;  %v1024_v24 = vrot.slane %v4437_v61, %v4103_v12  ;;  %v1134_v61 = vsel %vm1133_vm5, %v1020_v0, %v1132_v3  ;;  %v1145_v22 = vsel %vm1137_vm7, %v1060_v40, %v1144_v19 }
 0x37d   : > { %v1696_v0 = vshll.u32 %v1695_v10, 16  ;;  %v1680_v3 = vcvt.f32.s32 %v4414_v14  ;;  %v1755_v60 = vcvt.f32.s32 %v4420_v42  ;;  %vm1861_vm0 = vcmask 31744  }
 0x37e   : > { %v1151_v44 = vsel %vm1135_vm6, %v1088_v36, %v1150_v48  ;;  %v1136_v5 = vsel %vm1135_vm6, %v1024_v24, %v1134_v61  ;;  %v1725_v61 = vcvt.f32.s32 %v4412_v53 }
 0x37f   : > { %v922_v7 = vpop.permute.xlu1 %921 }
 0x380   : > { %v1028_v9 = vrot.slane %v922_v7, %v4103_v12  ;;  %v1158_v7 = vsel %vm1135_vm6, %v1120_v38, %v1157_v18 }
 0x381   : > { %v1159_v25 = vsel %vm1137_vm7, %v1124_v6, %v1158_v7  ;;  %v2058_v7 = vrot.slane %v4316_v29, %v4103_v12 }
 0x382   : > { %v1138_v17 = vsel %vm1137_vm7, %v1028_v9, %v1136_v5  ;;  %v1180_v55 = vcombine.low %v1145_v22, %v1159_v25  ;;  %v1710_v5 = vcvt.f32.s32 %v4422_v63 }
 0x383   : > { %v970_v16 = vpop.permute.xlu1 %969 }
 0x384   : > { %v1092_v35 = vrot.slane %v970_v16, %v4103_v12  ;;  %v1665_v16 = vcvt.f32.s32 %v4399_v57  ;;  %v1188_v47 = vrot.slane %v1180_v55, %v4196_v21  ;;  %v2046_v57 = vrot.slane %v4341_v39, %v4103_v12 }
 0x386   : > { %v1152_v43 = vsel %vm1137_vm7, %v1092_v35, %v1151_v44  ;;  %v1666_v50 = vshll.u32 %v1665_v16, 16  ;;  %v2071_v24 = vsel %vm1125_vm1, %v2046_v57, %v2042_v58  ;;  %v1181_v44 = vcombine.high %v1145_v22, %v1159_v25 }
 0x387   : > { %v1164_v49 = vcombine.low %v1138_v17, %v1152_v43  ;;  %v1165_v9 = vcombine.high %v1138_v17, %v1152_v43  ;;  %v2072_v13 = vsel %vm1127_vm2, %v2050_v37, %v2071_v24  ;;  %v1681_v43 = vshll.u32 %v1680_v3, 16 }
 0x388   : > { %v2073_v51 = vsel %vm1129_vm3, %v2054_v28, %v2072_v13  ;;  %v1195_v17 = vrot.slane %v1181_v44, %v4196_v21  ;;  %v1740_v25 = vcvt.f32.s32 %v4429_v45  ;;  %v1726_v22 = vshll.u32 %v1725_v61, 16 }
 0x389   : > { %v1172_v52 = vrot.slane %v1164_v49, %v4196_v21  ;;  %v1179_v18 = vrot.slane %v1165_v9, %v4196_v21  ;;  %v2074_v53 = vsel %vm1131_vm4, %v2058_v7, %v2073_v51  ;;  %v2062_v49 = vrot.slane %v4330_v41, %v4103_v12 }
 0x38a   : > { %v1756_v21 = vshll.u32 %v1755_v60, 16  ;;  %v1741_v10 = vshll.u32 %v1740_v25, 16 }
 0x38b   : > { %v1196_v23 = vcombine.low %v1172_v52, %v1188_v47  ;;  %v1197_v56 = vcombine.high %v1172_v52, %v1188_v47  ;;  %v1212_v55 = vcombine.low %v1179_v18, %v1195_v17  ;;  %v5209_v47 = vmov 0.0  }
 0x38d   : > { %v4532_v32 = vrot.slane %v1196_v23, %v4202_v30  ;;  %v4542_v38 = vrot.slane %v1197_v56, %v4202_v30  ;;  %v1711_v23 = vshll.u32 %v1710_v5, 16 }
 0x38f   : > { %v4568_v63 = vcombine.high %v4532_v32, %v5209_v47 }
 0x3e8   : > { %v1663_v26 = vpop.xlane.xlu1 %1662 }
 0x3e9   : > { %v1664_v62 = vcvt.f32.s32 %v1663_v26 }
 0x3eb   : > { %v1667_v27 = vadd.s32 %v1666_v50, %v1664_v62  ;;  %v2075_v50 = vsel %vm1133_vm5, %v2062_v49, %v2074_v53  ;;  %v1613_v49 = vsel %vm1588_vm8, %v4532_v32, -inf }
 0x3ec   : > { %v1693_v36 = vpop.xlane.xlu0 %1692 }
 0x3ed   : > { %v1694_v4 = vcvt.f32.s32 %v1693_v36  ;;  %vm1773_vm9 = vcmp.eq.s32.totalorder %v4099_v8, %v1667_v27  ;;  %v1770_v36 = vcvt.f32.s32 %v4433_v34  ;;  %v2066_v34 = vrot.slane %v4325_v54, %v4103_v12 }
 0x3ee   : > { %v1781_v35 = vsel %vm1773_vm9, %v4532_v32, 0.0 }
 0x3ef   : > { %v1697_v15 = vadd.s32 %v1696_v0, %v1694_v4  ;;  %v1789_v46 = vsel %vm1588_vm8, %v1781_v35, 0.0  ;;  %v1213_v0 = vcombine.high %v1179_v18, %v1195_v17  ;;  %v4577_v35 = vcombine.high %v4542_v38, %v5209_v47 }
 0x3f0   : > { %1790 = vadd.xlane.f32.xlu0 %v1789_v46  ;;  %v2076_v61 = vsel %vm1135_vm6, %v2066_v34, %v2075_v50  ;;  %v1771_v18 = vshll.u32 %v1770_v36, 16 }
 0x3f1   : > { %vm1775_vm10 = vcmp.eq.s32.totalorder %v4099_v8, %v1697_v15  ;;  %v4580_v15 = vrot.slane %v1212_v55, %v4202_v30  ;;  %v4595_v44 = vrot.slane %v1213_v0, %v4202_v30  ;;  %v1622_v55 = vsel %vm1588_vm8, %v4577_v35, -inf }
 0x3f2   : > { %v1783_v48 = vsel %vm1775_vm10, %v4542_v38, 0.0  ;;  %vm2008_vm10 = vcmask 7168  }
 0x3f3   : > { %v1795_v6 = vsel %vm1588_vm8, %v1783_v48, 0.0  ;;  %v4592_v28 = vcombine.high %v4580_v15, %v5209_v47  ;;  %v4608_v60 = vcombine.high %v4595_v44, %v5209_v47  ;;  %v1631_v47 = vsel %vm1588_vm8, %v4595_v44, -inf }
 0x3f4   : > { %1796 = vadd.xlane.f32.xlu0 %v1795_v6 }
 0x3f7   : > { %v1678_v40 = vpop.xlane.xlu0 %1677 }
 0x3f8   : > { %v1679_v14 = vcvt.f32.s32 %v1678_v40 }
 0x3fa   : > { %v1682_v19 = vadd.s32 %v1681_v43, %v1679_v14  ;;  %v2070_v43 = vrot.slane %v4353_v59, %v4103_v12 }
 0x3fb   : > { %v1708_v52 = vpop.xlane.xlu1 %1707  ;;  %v1723_v16 = vpop.xlane.xlu0 %1722 }
 0x3fc   : > { %v1709_v42 = vcvt.f32.s32 %v1708_v52  ;;  %v1724_v26 = vcvt.f32.s32 %v1723_v16  ;;  %vm1774_vm11 = vcmp.eq.s32.totalorder %v4099_v8, %v1682_v19  ;;  %v4611_v17 = vsel %vm1137_vm7, %v2070_v43, %v2076_v61 }
 0x3fd   : > { %v1782_v45 = vsel %vm1774_vm11, %v4568_v63, 0.0  ;;  %5210 = vst [vmem:[#allocation20_spill] sm:$0xff] %v4611_v17  ;;  %v2079_v53 = vsel %vm1861_vm0, %v4611_v17, -inf  ;;  %v1625_v52 = vsel %vm1588_vm8, %v4580_v15, -inf  ;;  %v1628_v16 = vsel %vm1588_vm8, %v4592_v28, -inf }
 0x3fe   : > { %v1712_v62 = vadd.s32 %v1711_v23, %v1709_v42  ;;  %v1727_v27 = vadd.s32 %v1726_v22, %v1724_v26  ;;  %v1792_v56 = vsel %vm1588_vm8, %v1782_v45, 0.0  ;;  %v1616_v22 = vsel %vm1588_vm8, %v4568_v63, -inf }
 0x3ff   : > { %v1738_v4 = vpop.xlane.xlu1 %1737  ;;  %1793 = vadd.xlane.f32.xlu1 %v1792_v56  ;;  %v1753_v57 = vpop.xlane.xlu0 %1752 }
 0x400   : > { %v1739_v46 = vcvt.f32.s32 %v1738_v4  ;;  %v1754_v58 = vcvt.f32.s32 %v1753_v57  ;;  %vm1776_vm12 = vcmp.eq.s32.totalorder %v4099_v8, %v1712_v62  ;;  %vm1777_vm13 = vcmp.eq.s32.totalorder %v4099_v8, %v1727_v27 }
 0x401   : > { %v1784_v24 = vsel %vm1776_vm12, %v4577_v35, 0.0  ;;  %v1785_v48 = vsel %vm1777_vm13, %v4580_v15, 0.0 }
 0x402   : > { %v1742_v37 = vadd.s32 %v1741_v10, %v1739_v46  ;;  %v1757_v6 = vadd.s32 %v1756_v21, %v1754_v58  ;;  %v1798_v9 = vsel %vm1588_vm8, %v1784_v24, 0.0  ;;  %v1801_v3 = vsel %vm1588_vm8, %v1785_v48, 0.0 }
 0x403   : > { %v1768_v13 = vpop.xlane.xlu1 %1767  ;;  %1799 = vadd.xlane.f32.xlu1 %v1798_v9  ;;  %1802 = vadd.xlane.f32.xlu0 %v1801_v3 }
 0x404   : > { %v1769_v40 = vcvt.f32.s32 %v1768_v13  ;;  %vm1778_vm14 = vcmp.eq.s32.totalorder %v4099_v8, %v1742_v37  ;;  %vm1779_vm15 = vcmp.eq.s32.totalorder %v4099_v8, %v1757_v6  ;;  %v4673_v13 = vsub.s32 2, %v3756_v1 }
 0x405   : > { %v1786_v51 = vsel %vm1778_vm14, %v4592_v28, 0.0  ;;  %v1787_v7 = vsel %vm1779_vm15, %v4595_v44, 0.0 }
 0x406   : > { %v1772_v5 = vadd.s32 %v1771_v18, %v1769_v40  ;;  %v1804_v14 = vsel %vm1588_vm8, %v1786_v51, 0.0  ;;  %v1807_v30 = vsel %vm1588_vm8, %v1787_v7, 0.0  ;;  %v4680_v51 = vsub.s32 3, %v3756_v1 }
 0x407   : > { %1805 = vadd.xlane.f32.xlu1 %v1804_v14  ;;  %1808 = vadd.xlane.f32.xlu0 %v1807_v30  ;;  %v4690_v14 = vsub.s32 5, %v3756_v1 }
 0x408   : > { %vm1780_vm9 = vcmp.eq.s32.totalorder %v4099_v8, %v1772_v5  ;;  %v1619_v8 = vsel %vm1588_vm8, %v4542_v38, -inf  ;;  %v1634_v5 = vsel %vm1588_vm8, %v4608_v60, -inf }
 0x409   : > { %v1788_v25 = vsel %vm1780_vm9, %v4608_v60, 0.0 }
 0x40a   : > { %v1810_v19 = vsel %vm1588_vm8, %v1788_v25, 0.0 }
 0x40b   : > { %1811 = vadd.xlane.f32.xlu1 %v1810_v19  ;;  %2080 = vmax.xlane.f32.xlu0 %v2079_v53  ;;  %v4699_v53 = vsub.s32 7, %v3756_v1 }
 0x40f   : > { %1614 = vmax.xlane.f32.xlu1 %v1613_v49  ;;  %1617 = vmax.xlane.f32.xlu0 %v1616_v22 }
 0x413   : > { %1620 = vmax.xlane.f32.xlu1 %v1619_v8  ;;  %1623 = vmax.xlane.f32.xlu0 %v1622_v55 }
 0x417   : > { %1626 = vmax.xlane.f32.xlu1 %v1625_v52  ;;  %1629 = vmax.xlane.f32.xlu0 %v1628_v16 }
 0x41b   : > { %1632 = vmax.xlane.f32.xlu0 %v1631_v47 }
 0x47d   : > { %v4632_v23 = vpop.xlane.xlu0 %1790 }
 0x47e   : > { %v2260_v10 = vrot.slane %v4632_v23, %v4103_v12 }
 0x481   : > { %v4636_v26 = vpop.xlane.xlu0 %1796 }
 0x482   : > { %v2268_v36 = vrot.slane %v4636_v26, %v4103_v12 }
 0x48c   : > { %v4634_v42 = vpop.xlane.xlu1 %1793 }
 0x48d   : > { %v2264_v21 = vrot.slane %v4634_v42, %v4103_v12 }
 0x48f   : > { %v2289_v62 = vsel %vm1125_vm1, %v2264_v21, %v2260_v10 }
 0x490   : > { %v4640_v45 = vpop.xlane.xlu1 %1799  ;;  %v4642_v50 = vpop.xlane.xlu0 %1802  ;;  %v2290_v0 = vsel %vm1127_vm2, %v2268_v36, %v2289_v62 }
 0x491   : > { %v2272_v27 = vrot.slane %v4640_v45, %v4103_v12  ;;  %v2276_v4 = vrot.slane %v4642_v50, %v4103_v12 }
 0x493   : > { %v2291_v46 = vsel %vm1129_vm3, %v2272_v27, %v2290_v0 }
 0x494   : > { %v4649_v56 = vpop.xlane.xlu1 %1805  ;;  %v4656_v57 = vpop.xlane.xlu0 %1808  ;;  %v2292_v24 = vsel %vm1131_vm4, %v2276_v4, %v2291_v46 }
 0x495   : > { %v2280_v58 = vrot.slane %v4649_v56, %v4103_v12  ;;  %v2284_v48 = vrot.slane %v4656_v57, %v4103_v12 }
 0x497   : > { %v2293_v37 = vsel %vm1133_vm5, %v2280_v58, %v2292_v24 }
 0x498   : > { %v4661_v34 = vpop.xlane.xlu1 %1811  ;;  %v4669_v9 = vpop.xlane.xlu0 %2080  ;;  %v2294_v3 = vsel %vm1135_vm6, %v2284_v48, %v2293_v37 }
 0x499   : > { %v2288_v6 = vrot.slane %v4661_v34, %v4103_v12  ;;  %5211 = vst [vmem:[#allocation21_spill] sm:$0xff] %v4669_v9  ;;  %v2086_v61 = vrot.slane %v4669_v9, %v3759_v2  ;;  %v2094_v7 = vrot.slane %v4669_v9, %v4673_v13  ;;  %v2098_v30 = vrot.slane %v4669_v9, %v4680_v51 }
 0x49a   : > { %v2106_v49 = vrot.slane %v4669_v9, %v4690_v14  ;;  %v2114_v55 = vrot.slane %v4669_v9, %v4699_v53 }
 0x49b   : > { %v2295_v18 = vsel %vm1137_vm7, %v2288_v6, %v2294_v3  ;;  %v4685_v43 = vsub.f32 %v4295_v11, %v2086_v61  ;;  %v4695_v25 = vsub.f32 %v4300_v20, %v2094_v7  ;;  %v4704_v22 = vsub.f32 %v4309_v31, %v2098_v30 }
 0x49c   : > { %v2297_v40 = vsel %vm1861_vm0, %v2295_v18, -inf  ;;  %v4710_v52 = vsub.f32 %v4330_v41, %v2106_v49  ;;  %v4714_v47 = vsub.f32 %v4353_v59, %v2114_v55  ;;  %v4718_v46 = vpop.xlane.xlu0 %1617  ;;  %v4720_v58 = vpop.xlane.xlu1 %1614 }
 0x49d   : > { %2298 = vmax.xlane.f32.xlu1 %v2297_v40  ;;  %v2131_v19 = vmul.f32 1.442695, %v4685_v43  ;;  %v2135_v8 = vmul.f32 1.442695, %v4695_v25  ;;  %v2137_v16 = vmul.f32 1.442695, %v4704_v22  ;;  %v1824_v37 = vrot.slane %v4720_v58, %v4103_v12 }
 0x49e   : > { %v2141_v21 = vmul.f32 1.442695, %v4710_v52  ;;  %v2145_v62 = vmul.f32 1.442695, %v4714_v47  ;;  %v1828_v6 = vrot.slane %v4718_v46, %v4103_v12 }
 0x49f   : > { %3248 = vpow2.f32 %v2131_v19  ;;  %v4743_v19 = vsub.s32 1, %v3756_v1 }
 0x4a0   : > { %3250 = vpow2.f32 %v2135_v8  ;;  %v4722_v24 = vpop.xlane.xlu0 %1623  ;;  %v4724_v48 = vpop.xlane.xlu1 %1620  ;;  %v1853_v40 = vsel %vm1125_vm1, %v1828_v6, %v1824_v37 }
 0x4a1   : > { %1635 = vmax.xlane.f32.xlu1 %v1634_v5  ;;  %3252 = vpow2.f32 %v2137_v16  ;;  %v1832_v61 = vrot.slane %v4724_v48, %v4103_v12  ;;  %v1836_v7 = vrot.slane %v4722_v24, %v4103_v12 }
 0x4a2   : > { %3254 = vpow2.f32 %v2141_v21 }
 0x4a3   : > { %3256 = vpow2.f32 %v2145_v62  ;;  %v1854_v5 = vsel %vm1127_vm2, %v1832_v61, %v1853_v40 }
 0x4a4   : > { %v4730_v3 = vpop.xlane.xlu0 %1629  ;;  %v4734_v18 = vpop.xlane.xlu1 %1626  ;;  %v1855_v55 = vsel %vm1129_vm3, %v1836_v7, %v1854_v5  ;;  %v2090_v5 = vrot.slane %v4669_v9, %v4743_v19 }
 0x4a5   : > { %v1840_v30 = vrot.slane %v4734_v18, %v4103_v12  ;;  %v1844_v16 = vrot.slane %v4730_v3, %v4103_v12 }
 0x4a7   : > { %v1856_v62 = vsel %vm1131_vm4, %v1840_v30, %v1855_v55 }
 0x4a8   : > { %v4745_v49 = vpop.xlane.xlu0 %1632  ;;  %v1857_v40 = vsel %vm1133_vm5, %v1844_v16, %v1856_v62  ;;  %v4794_v62 = vsub.f32 %v4341_v39, %v2090_v5 }
 0x4a9   : > { %v3249_v10 = vpop.eup %3248 }
 0x4aa   : > { %v3251_v27 = vpop.eup %3250 }
 0x4ab   : > { %v3253_v36 = vpop.eup %3252 }
 0x4ac   : > { %v3255_v0 = vpop.eup %3254 }
 0x4ad   : > { %v3257_v4 = vpop.eup %3256 }
 0x4b2   : > { %2156 = vperm.xlu1 %3247, %v3249_v10  }
 0x4b6   : > { %2162 = vperm.xlu1 %3247, %v3251_v27   ;;  %v1848_v27 = vrot.slane %v4745_v49, %v4103_v12 }
 0x4b8   : > { %v1858_v7 = vsel %vm1135_vm6, %v1848_v27, %v1857_v40 }
 0x4ba   : > { %2165 = vperm.xlu1 %3247, %v3253_v36  }
 0x4be   : > { %2171 = vperm.xlu1 %3247, %v3255_v0  }
 0x4c2   : > { %2177 = vperm.xlu1 %3247, %v3257_v4  }
 0x52a   : > { %v4747_v8 = vpop.xlane.xlu1 %2298 }
 0x52b   : > { %v2308_v21 = vrot.slane %v4747_v8, %v4743_v19  ;;  %v2316_v10 = vrot.slane %v4747_v8, %v4680_v51  ;;  %v2324_v0 = vrot.slane %v4747_v8, %v4690_v14 }
 0x52d   : > { %v4760_v36 = vsub.f32 %v4634_v42, %v2308_v21  ;;  %v4765_v4 = vsub.f32 %v4640_v45, %v2316_v10  ;;  %v4775_v42 = vsub.s32 4, %v3756_v1  ;;  %v2332_v45 = vrot.slane %v4747_v8, %v4699_v53 }
 0x52e   : > { %v4767_v37 = vpop.xlane.xlu1 %1635  ;;  %v4785_v55 = vsub.f32 %v4649_v56, %v2324_v0  ;;  %v4791_v10 = vsub.s32 6, %v3756_v1  ;;  %v2133_v0 = vmul.f32 1.442695, %v4794_v62 }
 0x52f   : > { %v2351_v6 = vmul.f32 1.442695, %v4760_v36  ;;  %v1852_v61 = vrot.slane %v4767_v37, %v4103_v12  ;;  %v2355_v16 = vmul.f32 1.442695, %v4765_v4  ;;  %v2102_v27 = vrot.slane %v4669_v9, %v4775_v42 }
 0x530   : > { %5213 = vst [vmem:[#allocation23_spill] sm:$0xff] %v4785_v55  ;;  %v2359_v56 = vmul.f32 1.442695, %v4785_v55  ;;  %v2328_v17 = vrot.slane %v4747_v8, %v4791_v10 }
 0x531   : > { %v4782_v30 = vsel %vm1137_vm7, %v1852_v61, %v1858_v7  ;;  %3258 = vpow2.f32 %v2351_v6  ;;  %v4799_v61 = vsub.f32 %v4661_v34, %v2332_v45  ;;  %v2110_v6 = vrot.slane %v4669_v9, %v4791_v10 }
 0x532   : > { %5212 = vst [vmem:[#allocation22_spill] sm:$0xff] %v4782_v30  ;;  %v1862_v21 = vsel %vm1861_vm0, %v4782_v30, -inf  ;;  %3260 = vpow2.f32 %v2355_v16  ;;  %v4806_v1 = vsub.f32 %v4316_v29, %v2102_v27  ;;  %v2304_v45 = vrot.slane %v4747_v8, %v3759_v2 }
 0x533   : > { %1863 = vmax.xlane.f32.xlu0 %v1862_v21  ;;  %5214 = vst [vmem:[#allocation24_spill] sm:$0xff] %v4799_v61  ;;  %3262 = vpow2.f32 %v2359_v56  ;;  %v2363_v40 = vmul.f32 1.442695, %v4799_v61  ;;  %v4810_v34 = vsub.f32 %v4325_v54, %v2110_v6  ;;  %v2312_v27 = vrot.slane %v4747_v8, %v4673_v13 }
 0x534   : > { %3264 = vpow2.f32 %v2133_v0  ;;  %v2139_v5 = vmul.f32 1.442695, %v4806_v1  ;;  %v4819_v56 = vsub.f32 %v4632_v23, %v2304_v45  ;;  %v2320_v6 = vrot.slane %v4747_v8, %v4775_v42 }
 0x535   : > { %5215 = vst [vmem:[#allocation25_spill] sm:$0xff] %v4810_v34  ;;  %3266 = vpow2.f32 %v2363_v40  ;;  %v2143_v21 = vmul.f32 1.442695, %v4810_v34 }
 0x536   : > { %3268 = vpow2.f32 %v2139_v5  ;;  %v2349_v40 = vmul.f32 1.442695, %v4819_v56  ;;  %v4830_v23 = vsub.f32 %v4642_v50, %v2320_v6 }
 0x537   : > { %3270 = vpow2.f32 %v2143_v21 }
 0x538   : > { %5217 = vst [vmem:[#allocation27_spill] sm:$0xff] %v4830_v23  ;;  %3272 = vpow2.f32 %v2349_v40 }
 0x53b   : > { %v3259_v7 = vpop.eup %3258 }
 0x53c   : > { %2377 = vperm.xlu1 %3247, %v3259_v7   ;;  %v3261_v16 = vpop.eup %3260  ;;  %v4824_v7 = vsub.f32 %v4636_v26, %v2312_v27  ;;  %v4834_v26 = vsub.f32 %v4656_v57, %v2328_v17  ;;  %v2357_v27 = vmul.f32 1.442695, %v4830_v23 }
 0x53d   : > { %v3263_v0 = vpop.eup %3262 }
 0x53e   : > { %5216 = vst [vmem:[#allocation26_spill] sm:$0xff] %v4824_v7  ;;  %v3265_v5 = vpop.eup %3264  ;;  %v2353_v45 = vmul.f32 1.442695, %v4824_v7  ;;  %5218 = vst [vmem:[#allocation28_spill] sm:$0xff] %v4834_v26 }
 0x540   : > { %2383 = vperm.xlu1 %3247, %v3261_v16   ;;  %v3267_v16 = vpop.eup %3266  ;;  %3274 = vpow2.f32 %v2353_v45 }
 0x541   : > { %v3269_v21 = vpop.eup %3268  ;;  %3276 = vpow2.f32 %v2357_v27 }
 0x544   : > { %2389 = vperm.xlu1 %3247, %v3263_v0   ;;  %v3271_v0 = vpop.eup %3270 }
 0x545   : > { %v3273_v8 = vpop.eup %3272 }
 0x548   : > { %2395 = vperm.xlu1 %3247, %v3267_v16   ;;  %v2157_v16 = vpop.permute.xlu1 %2156 }
 0x549   : > { %2159 = vperm.xlu0 %3246, %v3265_v5   ;;  %v2361_v5 = vmul.f32 1.442695, %v4834_v26  ;;  %v2182_v30 = vrot.slane %v2157_v16, %v4103_v12 }
 0x54a   : > { %v3275_v50 = vpop.eup %3274 }
 0x54b   : > { %3278 = vpow2.f32 %v2361_v5  ;;  %v3277_v6 = vpop.eup %3276 }
 0x54c   : > { %v2163_v17 = vpop.permute.xlu1 %2162 }
 0x54d   : > { %2168 = vperm.xlu0 %3246, %v3269_v21   ;;  %v2190_v61 = vrot.slane %v2163_v17, %v4103_v12 }
 0x550   : > { %v2166_v27 = vpop.permute.xlu1 %2165 }
 0x551   : > { %2174 = vperm.xlu0 %3246, %v3271_v0  }
 0x554   : > { %v2172_v26 = vpop.permute.xlu1 %2171 }
 0x555   : > { %2374 = vperm.xlu0 %3246, %v3273_v8   ;;  %v3279_v40 = vpop.eup %3278 }
 0x559   : > { %2380 = vperm.xlu0 %3246, %v3275_v50  }
 0x55d   : > { %2386 = vperm.xlu0 %3246, %v3277_v6  }
 0x561   : > { %2392 = vperm.xlu0 %3246, %v3279_v40  }
 0x5c0   : > { %v4838_v57 = vpop.xlane.xlu0 %1863 }
 0x5c1   : > { %v1873_v45 = vrot.slane %v4838_v57, %v4743_v19  ;;  %v1881_v21 = vrot.slane %v4838_v57, %v4680_v51  ;;  %v1889_v5 = vrot.slane %v4838_v57, %v4690_v14 }
 0x5c3   : > { %v1907_v0 = vsub.f32 %v4718_v46, %v1873_v45  ;;  %v1909_v8 = vsub.f32 %v4722_v24, %v1881_v21  ;;  %v1911_v6 = vsub.f32 %v4730_v3, %v1889_v5  ;;  %v2194_v45 = vrot.slane %v2166_v27, %v4103_v12 }
 0x5c5   : > { %v1916_v50 = vmul.f32 1.442695, %v1907_v0  ;;  %v1920_v40 = vmul.f32 1.442695, %v1909_v8  ;;  %v1924_v55 = vmul.f32 1.442695, %v1911_v6  ;;  %v1869_v6 = vrot.slane %v4838_v57, %v3759_v2 }
 0x5c7   : > { %3280 = vpow2.f32 %v1916_v50  ;;  %v2178_v50 = vpop.permute.xlu1 %2177 }
 0x5c8   : > { %v2160_v9 = vpop.permute.xlu0 %2159  ;;  %3282 = vpow2.f32 %v1920_v40 }
 0x5c9   : > { %v2186_v23 = vrot.slane %v2160_v9, %v4103_v12  ;;  %v2202_v9 = vrot.slane %v2172_v26, %v4103_v12  ;;  %3284 = vpow2.f32 %v1924_v55  ;;  %v1877_v55 = vrot.slane %v4838_v57, %v4673_v13 }
 0x5cb   : > { %v2211_v7 = vsel %vm1125_vm1, %v2186_v23, %v2182_v30  ;;  %v2210_v30 = vrot.slane %v2178_v50, %v4103_v12  ;;  %v1893_v50 = vrot.slane %v4838_v57, %v4791_v10 }
 0x5cc   : > { %v2212_v21 = vsel %vm1127_vm2, %v2190_v61, %v2211_v7  ;;  %v2169_v0 = vpop.permute.xlu0 %2168 }
 0x5cd   : > { %v2213_v5 = vsel %vm1129_vm3, %v2194_v45, %v2212_v21  ;;  %v2198_v8 = vrot.slane %v2169_v0, %v4103_v12  ;;  %v1906_v45 = vsub.f32 %v4720_v58, %v1869_v6  ;;  %v1908_v0 = vsub.f32 %v4724_v48, %v1877_v55 }
 0x5cf   : > { %v2214_v16 = vsel %vm1131_vm4, %v2198_v8, %v2213_v5  ;;  %v1914_v5 = vmul.f32 1.442695, %v1906_v45 }
 0x5d0   : > { %v2175_v17 = vpop.permute.xlu0 %2174  ;;  %v2215_v23 = vsel %vm1133_vm5, %v2202_v9, %v2214_v16  ;;  %v1918_v9 = vmul.f32 1.442695, %v1908_v0 }
 0x5d1   : > { %v2206_v27 = vrot.slane %v2175_v17, %v4103_v12  ;;  %v3281_v34 = vpop.eup %3280  ;;  %3286 = vpow2.f32 %v1914_v5  ;;  %v2378_v17 = vpop.permute.xlu1 %2377 }
 0x5d2   : > { %1942 = vperm.xlu1 %3247, %v3281_v34   ;;  %v3283_v26 = vpop.eup %3282  ;;  %v1885_v34 = vrot.slane %v4838_v57, %v4775_v42  ;;  %3288 = vpow2.f32 %v1918_v9  ;;  %v2404_v45 = vrot.slane %v2378_v17, %v4103_v12 }
 0x5d3   : > { %v2216_v61 = vsel %vm1135_vm6, %v2206_v27, %v2215_v23  ;;  %v3285_v21 = vpop.eup %3284  ;;  %v1912_v27 = vsub.f32 %v4745_v49, %v1893_v50 }
 0x5d4   : > { %v2217_v7 = vsel %vm1137_vm7, %v2210_v30, %v2216_v61  ;;  %v2375_v8 = vpop.permute.xlu0 %2374  ;;  %v1910_v16 = vsub.f32 %v4734_v18, %v1885_v34 }
 0x5d5   : > { %v2219_v40 = vsel %vm1861_vm0, %v2217_v7, 0.0  ;;  %v1926_v61 = vmul.f32 1.442695, %v1912_v27  ;;  %v2384_v7 = vpop.permute.xlu1 %2383 }
 0x5d6   : > { %2220 = vadd.xlane.f32.xlu0 %v2219_v40  ;;  %1948 = vperm.xlu1 %3247, %v3283_v26   ;;  %v1922_v30 = vmul.f32 1.442695, %v1910_v16  ;;  %v2400_v40 = vrot.slane %v2375_v8, %v4103_v12  ;;  %v2412_v16 = vrot.slane %v2384_v7, %v4103_v12  ;;  %v1897_v7 = vrot.slane %v4838_v57, %v4699_v53 }
 0x5d8   : > { %v2381_v23 = vpop.permute.xlu0 %2380  ;;  %3290 = vpow2.f32 %v1922_v30  ;;  %v2429_v34 = vsel %vm1125_vm1, %v2404_v45, %v2400_v40 }
 0x5d9   : > { %v2408_v55 = vrot.slane %v2381_v23, %v4103_v12  ;;  %3292 = vpow2.f32 %v1926_v61  ;;  %v2390_v0 = vpop.permute.xlu1 %2389 }
 0x5da   : > { %1954 = vperm.xlu1 %3247, %v3285_v21   ;;  %v2420_v23 = vrot.slane %v2390_v0, %v4103_v12  ;;  %v4898_v0 = vsub.f32 %v4206_v33, %v4295_v11  ;;  %v5221_v33 = vld [vmem:[#allocation16_spill] sm:$0xff] }
 0x5db   : > { %v3287_v6 = vpop.eup %3286  ;;  %v2430_v5 = vsel %vm1127_vm2, %v2408_v55, %v2429_v34  ;;  %v4913_v11 = vsub.f32 %v5221_v33, %v4330_v41 }
 0x5dc   : > { %v2387_v26 = vpop.permute.xlu0 %2386  ;;  %v3289_v21 = vpop.eup %3288  ;;  %v2431_v27 = vsel %vm1129_vm3, %v2412_v16, %v2430_v5  ;;  %v5219_v16 = vld [vmem:[#allocation13_spill] sm:$0xff] }
 0x5dd   : > { %v2416_v50 = vrot.slane %v2387_v26, %v4103_v12  ;;  %v2396_v61 = vpop.permute.xlu1 %2395 }
 0x5de   : > { %v2428_v55 = vrot.slane %v2396_v61, %v4103_v12  ;;  %v4918_v61 = vsub.f32 %v4532_v32, %v4720_v58 }
 0x5df   : > { %v2432_v30 = vsel %vm1131_vm4, %v2416_v50, %v2431_v27  ;;  %v2737_v50 = vmul.f32 1.442695, %v4898_v0  ;;  %v5220_v27 = vld [vmem:[#allocation14_spill] sm:$0xff] }
 0x5e0   : > { %v2393_v9 = vpop.permute.xlu0 %2392  ;;  %v2433_v40 = vsel %vm1133_vm5, %v2420_v23, %v2432_v30  ;;  %v4908_v30 = vsub.f32 %v5220_v27, %v4309_v31  ;;  %v5222_v31 = vld [vmem:[#allocation18_spill] sm:$0xff] }
 0x5e1   : > { %v2424_v17 = vrot.slane %v2393_v9, %v4103_v12  ;;  %v4903_v9 = vsub.f32 %v5219_v16, %v4300_v20  ;;  %v2747_v20 = vmul.f32 1.442695, %v4913_v11 }
 0x5e2   : > { %v3291_v8 = vpop.eup %3290 }
 0x5e3   : > { %v2434_v26 = vsel %vm1135_vm6, %v2424_v17, %v2433_v40  ;;  %v2743_v17 = vmul.f32 1.442695, %v4908_v30  ;;  %v4922_v40 = vsub.f32 %v5222_v31, %v4353_v59 }
 0x5e4   : > { %v2435_v45 = vsel %vm1137_vm7, %v2428_v55, %v2434_v26  ;;  %v2673_v26 = vmul.f32 1.442695, %v4918_v61 }
 0x5e5   : > { %v2437_v34 = vsel %vm1861_vm0, %v2435_v45, 0.0  ;;  %v2751_v55 = vmul.f32 1.442695, %v4922_v40  ;;  %v4929_v45 = vsub.f32 %v4577_v35, %v4722_v24  ;;  %v4945_v24 = vsub.f32 %v4608_v60, %v4767_v37 }
 0x5e7   : > { %v2679_v59 = vmul.f32 1.442695, %v4929_v45 }
 0x5ec   : > { %1939 = vperm.xlu0 %3246, %v3287_v6   ;;  %v3293_v6 = vpop.eup %3292 }
 0x5f0   : > { %1945 = vperm.xlu0 %3246, %v3289_v21   ;;  %v1913_v21 = vsub.f32 %v4767_v37, %v1897_v7 }
 0x5f2   : > { %v1928_v5 = vmul.f32 1.442695, %v1913_v21  ;;  %v4935_v21 = vsub.f32 %v4592_v28, %v4730_v3 }
 0x5f4   : > { %1951 = vperm.xlu0 %3246, %v3291_v8   ;;  %3294 = vpow2.f32 %v1928_v5  ;;  %v2741_v8 = vmul.f32 1.442695, %v4903_v9  ;;  %v2683_v35 = vmul.f32 1.442695, %v4935_v21 }
 0x5f5   : > { %3296 = vpow2.f32 %v2737_v50 }
 0x5f6   : > { %3298 = vpow2.f32 %v2741_v8  ;;  %v5224_v8 = vld [vmem:[#allocation15_spill] sm:$0xff] }
 0x5f7   : > { %3300 = vpow2.f32 %v2743_v17  ;;  %v4949_v27 = vsub.f32 %v5224_v8, %v4316_v29  ;;  %v2687_v17 = vmul.f32 1.442695, %v4945_v24 }
 0x5f8   : > { %1957 = vperm.xlu0 %3246, %v3293_v6   ;;  %3302 = vpow2.f32 %v2747_v20 }
 0x5f9   : > { %3304 = vpow2.f32 %v2673_v26  ;;  %v2745_v33 = vmul.f32 1.442695, %v4949_v27 }
 0x5fa   : > { %3306 = vpow2.f32 %v2751_v55 }
 0x5fb   : > { %3308 = vpow2.f32 %v2679_v59 }
 0x5fc   : > { %3310 = vpow2.f32 %v2683_v35 }
 0x5fe   : > { %2438 = vadd.xlane.f32.xlu1 %v2437_v34  ;;  %v3295_v23 = vpop.eup %3294  ;;  %v5223_v34 = vld [vmem:[#allocation19_spill] sm:$0xff] }
 0x5ff   : > { %v3297_v6 = vpop.eup %3296  ;;  %v4939_v5 = vsub.f32 %v5223_v34, %v4341_v39 }
 0x600   : > { %v2753_v41 = vsel %vm1588_vm8, %v3297_v6, 0.0  ;;  %v3299_v7 = vpop.eup %3298  ;;  %v4963_v6 = vsub.f32 %v4568_v63, %v4718_v46  ;;  %v4975_v46 = vsub.f32 %v4580_v15, %v4734_v18 }
 0x601   : > { %v2759_v32 = vsel %vm1588_vm8, %v3299_v7, 0.0  ;;  %v3301_v58 = vpop.eup %3300  ;;  %v2739_v28 = vmul.f32 1.442695, %v4939_v5 }
 0x602   : > { %v2762_v50 = vsel %vm1588_vm8, %v3301_v58, 0.0  ;;  %v3303_v16 = vpop.eup %3302 }
 0x603   : > { %v2768_v39 = vsel %vm1588_vm8, %v3303_v16, 0.0  ;;  %v3305_v3 = vpop.eup %3304  ;;  %3312 = vpow2.f32 %v2739_v28 }
 0x604   : > { %v2689_v60 = vsel %vm1588_vm8, %v3305_v3, 0.0  ;;  %v3307_v29 = vpop.eup %3306  ;;  %3314 = vpow2.f32 %v2687_v17 }
 0x605   : > { %3316 = vpow2.f32 %v2745_v33  ;;  %v2774_v31 = vsel %vm1588_vm8, %v3307_v29, 0.0  ;;  %v3309_v26 = vpop.eup %3308 }
 0x606   : > { %v2698_v7 = vsel %vm1588_vm8, %v3309_v26, 0.0  ;;  %v3311_v55 = vpop.eup %3310 }
 0x607   : > { %v2704_v58 = vsel %vm1588_vm8, %v3311_v55, 0.0 }
 0x60f   : > { %1960 = vperm.xlu1 %3247, %v3295_v23   ;;  %v5225_v23 = vld [vmem:[#allocation17_spill] sm:$0xff] }
 0x610   : > { %v4957_v20 = vsub.f32 %v5225_v23, %v4325_v54  ;;  %v2675_v54 = vmul.f32 1.442695, %v4963_v6 }
 0x612   : > { %v2749_v37 = vmul.f32 1.442695, %v4957_v20 }
 0x614   : > { %3318 = vpow2.f32 %v2749_v37 }
 0x615   : > { %3320 = vpow2.f32 %v2675_v54 }
 0x617   : > { %2754 = vadd.xlane.f32.xlu0 %v2753_v41  ;;  %v4969_v41 = vsub.f32 %v4542_v38, %v4724_v48  ;;  %v2681_v48 = vmul.f32 1.442695, %v4975_v46 }
 0x619   : > { %v2677_v63 = vmul.f32 1.442695, %v4969_v41 }
 0x61b   : > { %2760 = vadd.xlane.f32.xlu0 %v2759_v32  ;;  %v3313_v32 = vpop.eup %3312  ;;  %3322 = vpow2.f32 %v2677_v63 }
 0x61c   : > { %v3315_v59 = vpop.eup %3314  ;;  %v2756_v34 = vsel %vm1588_vm8, %v3313_v32, 0.0  ;;  %3324 = vpow2.f32 %v2681_v48 }
 0x61d   : > { %v3317_v38 = vpop.eup %3316  ;;  %v2710_v16 = vsel %vm1588_vm8, %v3315_v59, 0.0 }
 0x61e   : > { %v2765_v15 = vsel %vm1588_vm8, %v3317_v38, 0.0  ;;  %v3319_v18 = vpop.eup %3318 }
 0x61f   : > { %2763 = vadd.xlane.f32.xlu0 %v2762_v50  ;;  %v4982_v50 = vsub.f32 %v4595_v44, %v4745_v49  ;;  %v2771_v8 = vsel %vm1588_vm8, %v3319_v18, 0.0  ;;  %v3321_v28 = vpop.eup %3320 }
 0x621   : > { %v2685_v35 = vmul.f32 1.442695, %v4982_v50 }
 0x623   : > { %2769 = vadd.xlane.f32.xlu0 %v2768_v39  ;;  %3326 = vpow2.f32 %v2685_v35  ;;  %v2692_v39 = vsel %vm1588_vm8, %v3321_v28, 0.0 }
 0x625   : > { %v3323_v3 = vpop.eup %3322 }
 0x626   : > { %v2695_v44 = vsel %vm1588_vm8, %v3323_v3, 0.0  ;;  %v3325_v49 = vpop.eup %3324 }
 0x627   : > { %2690 = vadd.xlane.f32.xlu0 %v2689_v60  ;;  %v2701_v17 = vsel %vm1588_vm8, %v3325_v49, 0.0 }
 0x62b   : > { %2775 = vadd.xlane.f32.xlu0 %v2774_v31 }
 0x62d   : > { %v3327_v33 = vpop.eup %3326 }
 0x62e   : > { %v2707_v23 = vsel %vm1588_vm8, %v3327_v33, 0.0 }
 0x62f   : > { %2699 = vadd.xlane.f32.xlu0 %v2698_v7 }
 0x633   : > { %2705 = vadd.xlane.f32.xlu0 %v2704_v58  ;;  %2757 = vadd.xlane.f32.xlu1 %v2756_v34 }
 0x637   : > { %2711 = vadd.xlane.f32.xlu0 %v2710_v16  ;;  %2766 = vadd.xlane.f32.xlu1 %v2765_v15 }
 0x63b   : > { %2772 = vadd.xlane.f32.xlu1 %v2771_v8 }
 0x63f   : > { %2693 = vadd.xlane.f32.xlu1 %v2692_v39 }
 0x643   : > { %2696 = vadd.xlane.f32.xlu1 %v2695_v44 }
 0x647   : > { %2702 = vadd.xlane.f32.xlu1 %v2701_v17 }
 0x64b   : > { %2708 = vadd.xlane.f32.xlu1 %v2707_v23 }
 0x651   : > { %v1943_v37 = vpop.permute.xlu1 %1942 }
 0x652   : > { %v1969_v58 = vrot.slane %v1943_v37, %v4103_v12 }
 0x655   : > { %v1949_v54 = vpop.permute.xlu1 %1948 }
 0x656   : > { %v1977_v15 = vrot.slane %v1949_v54, %v4103_v12 }
 0x659   : > { %v1955_v59 = vpop.permute.xlu1 %1954 }
 0x65a   : > { %v1985_v17 = vrot.slane %v1955_v59, %v4103_v12 }
 0x663   : > { %v2221_v60 = vpop.xlane.xlu0 %2220 }
 0x664   : > { %3328 = vlog2.f32 %v2221_v60 }
 0x66b   : > { %v1940_v29 = vpop.permute.xlu0 %1939 }
 0x66c   : > { %v1965_v55 = vrot.slane %v1940_v29, %v4103_v12 }
 0x66e   : > { %v3329_v26 = vpop.eup %3328  ;;  %v1994_v34 = vsel %vm1125_vm1, %v1969_v58, %v1965_v55 }
 0x66f   : > { %v1946_v31 = vpop.permute.xlu0 %1945  ;;  %v4992_v7 = vmul.f32 0.6931472, %v3329_v26 }
 0x670   : > { %v1973_v63 = vrot.slane %v1946_v31, %v4103_v12 }
 0x671   : > { %v2495_v38 = vrot.slane %v4992_v7, %v3759_v2  ;;  %v2507_v8 = vrot.slane %v4992_v7, %v4680_v51  ;;  %v2499_v3 = vrot.slane %v4992_v7, %v4743_v19  ;;  %v2515_v33 = vrot.slane %v4992_v7, %v4690_v14 }
 0x672   : > { %v1995_v48 = vsel %vm1127_vm2, %v1973_v63, %v1994_v34  ;;  %v2503_v29 = vrot.slane %v4992_v7, %v4673_v13  ;;  %v2523_v63 = vrot.slane %v4992_v7, %v4699_v53 }
 0x673   : > { %v1952_v32 = vpop.permute.xlu0 %1951  ;;  %v1996_v28 = vsel %vm1129_vm3, %v1977_v15, %v1995_v48  ;;  %v2532_v39 = vsub.f32 %v4685_v43, %v2495_v38  ;;  %v2535_v60 = vsub.f32 %v4704_v22, %v2507_v8  ;;  %v2533_v26 = vsub.f32 %v4794_v62, %v2499_v3 }
 0x674   : > { %v1981_v16 = vrot.slane %v1952_v32, %v4103_v12  ;;  %v2537_v32 = vsub.f32 %v4710_v52, %v2515_v33  ;;  %v2534_v34 = vsub.f32 %v4695_v25, %v2503_v29  ;;  %v2511_v62 = vrot.slane %v4992_v7, %v4775_v42 }
 0x675   : > { %v2540_v31 = vmul.f32 1.442695, %v2532_v39  ;;  %v2546_v58 = vmul.f32 1.442695, %v2535_v60  ;;  %v2542_v59 = vmul.f32 1.442695, %v2533_v26 }
 0x676   : > { %v1997_v44 = vsel %vm1131_vm4, %v1981_v16, %v1996_v28  ;;  %v2550_v48 = vmul.f32 1.442695, %v2537_v32  ;;  %v2539_v16 = vsub.f32 %v4714_v47, %v2523_v63  ;;  %v2544_v52 = vmul.f32 1.442695, %v2534_v34 }
 0x677   : > { %v1958_v18 = vpop.permute.xlu0 %1957  ;;  %v1998_v37 = vsel %vm1133_vm5, %v1985_v17, %v1997_v44 }
 0x678   : > { %v1989_v49 = vrot.slane %v1958_v18, %v4103_v12  ;;  %v2536_v18 = vsub.f32 %v4806_v1, %v2511_v62  ;;  %v2554_v44 = vmul.f32 1.442695, %v2539_v16 }
 0x67a   : > { %v1999_v54 = vsel %vm1135_vm6, %v1989_v49, %v1998_v37  ;;  %v2548_v33 = vmul.f32 1.442695, %v2536_v18 }
 0x68b   : > { %v2439_v35 = vpop.xlane.xlu1 %2438 }
 0x68c   : > { %3330 = vlog2.f32 %v2439_v35  ;;  %v2519_v35 = vrot.slane %v4992_v7, %v4791_v10 }
 0x68d   : > { %3332 = vpow2.f32 %v2540_v31 }
 0x68e   : > { %3334 = vpow2.f32 %v2546_v58  ;;  %v5230_v58 = vld [vmem:[#allocation27_spill] sm:$0xff] }
 0x68f   : > { %v1961_v23 = vpop.permute.xlu1 %1960  ;;  %3336 = vpow2.f32 %v2542_v59 }
 0x690   : > { %v1993_v43 = vrot.slane %v1961_v23, %v4103_v12  ;;  %3338 = vpow2.f32 %v2550_v48  ;;  %v5226_v23 = vld [vmem:[#allocation25_spill] sm:$0xff] }
 0x691   : > { %3340 = vpow2.f32 %v2544_v52 }
 0x692   : > { %v2000_v55 = vsel %vm1137_vm7, %v1993_v43, %v1999_v54  ;;  %v5227_v43 = vld [vmem:[#allocation23_spill] sm:$0xff]  ;;  %3342 = vpow2.f32 %v2554_v44  ;;  %v5228_v54 = vld [vmem:[#allocation26_spill] sm:$0xff] }
 0x693   : > { %v2002_v22 = vsel %vm1861_vm0, %v2000_v55, 0.0  ;;  %3344 = vpow2.f32 %v2548_v33  ;;  %v5234_v33 = vld [vmem:[#allocation21_spill] sm:$0xff] }
 0x694   : > { %2003 = vadd.xlane.f32.xlu1 %v2002_v22  ;;  %v5229_v22 = vld [vmem:[#allocation24_spill] sm:$0xff] }
 0x696   : > { %v3331_v38 = vpop.eup %3330 }
 0x697   : > { %v2441_v15 = vmul.f32 0.6931472, %v3331_v38 }
 0x699   : > { %v2446_v8 = vrot.slane %v2441_v15, %v3759_v2  ;;  %v2458_v25 = vrot.slane %v2441_v15, %v4680_v51  ;;  %v2450_v28 = vrot.slane %v2441_v15, %v4743_v19  ;;  %v2466_v3 = vrot.slane %v2441_v15, %v4690_v14  ;;  %v3333_v51 = vpop.eup %3332 }
 0x69a   : > { %v2454_v1 = vrot.slane %v2441_v15, %v4673_v13  ;;  %v2538_v2 = vsub.f32 %v5226_v23, %v2519_v35  ;;  %v2474_v14 = vrot.slane %v2441_v15, %v4699_v53  ;;  %v2462_v37 = vrot.slane %v2441_v15, %v4775_v42  ;;  %v3335_v55 = vpop.eup %3334 }
 0x69b   : > { %v2483_v47 = vsub.f32 %v4819_v56, %v2446_v8  ;;  %v2486_v49 = vsub.f32 %v4765_v4, %v2458_v25  ;;  %v2484_v17 = vsub.f32 %v4760_v36, %v2450_v28  ;;  %v2488_v19 = vsub.f32 %v5227_v43, %v2466_v3  ;;  %v3337_v63 = vpop.eup %3336 }
 0x69c   : > { %v2485_v36 = vsub.f32 %v5228_v54, %v2454_v1  ;;  %v2552_v13 = vmul.f32 1.442695, %v2538_v2  ;;  %v2487_v59 = vsub.f32 %v5230_v58, %v2462_v37  ;;  %v2470_v62 = vrot.slane %v2441_v15, %v4791_v10  ;;  %v3339_v52 = vpop.eup %3338 }
 0x69d   : > { %v2556_v29 = vsub.f32 %v2532_v39, %v2483_v47  ;;  %v2559_v31 = vsub.f32 %v2535_v60, %v2486_v49  ;;  %v2557_v4 = vsub.f32 %v2533_v26, %v2484_v17  ;;  %v2490_v39 = vsub.f32 %v5229_v22, %v2474_v14  ;;  %v3341_v60 = vpop.eup %3340  ;;  %v5231_v26 = vld [vmem:[#allocation28_spill] sm:$0xff]  ;;  %v5054_v17 = vld [vmem:[%s348_s16] sm:$0xff] }
 0x69e   : > { %v2561_v48 = vsub.f32 %v2537_v32, %v2488_v19  ;;  %v2558_v42 = vsub.f32 %v2534_v34, %v2485_v36  ;;  %3346 = vpow2.f32 %v2552_v13  ;;  %v2489_v35 = vsub.f32 %v5231_v26, %v2470_v62  ;;  %v3343_v44 = vpop.eup %3342 }
 0x69f   : > { %v2564_v56 = vmul.f32 %v3333_v51, %v2556_v29  ;;  %v2567_v53 = vmul.f32 %v3335_v55, %v2559_v31  ;;  %v2565_v38 = vmul.f32 %v3337_v63, %v2557_v4  ;;  %v2563_v28 = vsub.f32 %v2539_v16, %v2490_v39  ;;  %v3345_v10 = vpop.eup %3344  ;;  %v5233_v16 = vld [vmem:[#allocation22_spill] sm:$0xff] }
 0x6a0   : > { %v2569_v8 = vmul.f32 %v3339_v52, %v2561_v48  ;;  %v2566_v25 = vmul.f32 %v3341_v60, %v2558_v42  ;;  %v2560_v3 = vsub.f32 %v2536_v18, %v2487_v59  ;;  %v2562_v32 = vsub.f32 %v2538_v2, %v2489_v35 }
 0x6a1   : > { %2581 = vperm.xlu0 %3246, %v2564_v56   ;;  %v2571_v15 = vmul.f32 %v3343_v44, %v2563_v28  ;;  %v2019_v18 = vmul.f32 %v5233_v16, %v5054_v17  ;;  %v2224_v23 = vadd.f32 %v4992_v7, %v5234_v33 }
 0x6a2   : > { %v2568_v47 = vmul.f32 %v3345_v10, %v2560_v3 }
 0x6a3   : > { %v2020_v1 = vsel %vm1861_vm0, %v2019_v18, 0.0  ;;  %v2225_v2 = vsel %vm2008_vm10, %v2224_v23, 0.0 }
 0x6a4   : > { %v2755_v29 = vpop.xlane.xlu0 %2754 }
 0x6a5   : > { %2590 = vperm.xlu0 %3246, %v2567_v53   ;;  %2584 = vperm.xlu1 %3247, %v2565_v38  }
 0x6a8   : > { %v3347_v34 = vpop.eup %3346  ;;  %v2761_v51 = vpop.xlane.xlu0 %2760 }
 0x6a9   : > { %2596 = vperm.xlu0 %3246, %v2569_v8   ;;  %2587 = vperm.xlu1 %3247, %v2566_v25   ;;  %v2570_v49 = vmul.f32 %v3347_v34, %v2562_v32 }
 0x6ac   : > { %v2764_v19 = vpop.xlane.xlu0 %2763 }
 0x6ad   : > { %2602 = vperm.xlu0 %3246, %v2571_v15   ;;  %2593 = vperm.xlu1 %3247, %v2568_v47  }
 0x6b0   : > { %v2770_v37 = vpop.xlane.xlu0 %2769 }
 0x6b1   : > { %2599 = vperm.xlu1 %3247, %v2570_v49  }
 0x6b4   : > { %v2691_v31 = vpop.xlane.xlu0 %2690 }
 0x6b8   : > { %v2776_v36 = vpop.xlane.xlu0 %2775 }
 0x6bc   : > { %v2700_v59 = vpop.xlane.xlu0 %2699 }
 0x6c0   : > { %v2758_v43 = vpop.xlane.xlu1 %2757  ;;  %v2706_v3 = vpop.xlane.xlu0 %2705 }
 0x6c1   : > { %3348 = vlog2.f32 %v2758_v43 }
 0x6c2   : > { %3350 = vlog2.f32 %v2755_v29 }
 0x6c3   : > { %3352 = vlog2.f32 %v2761_v51 }
 0x6c4   : > { %v2767_v14 = vpop.xlane.xlu1 %2766  ;;  %3354 = vlog2.f32 %v2764_v19  ;;  %v2712_v51 = vpop.xlane.xlu0 %2711 }
 0x6c5   : > { %3356 = vlog2.f32 %v2767_v14 }
 0x6c8   : > { %v2773_v56 = vpop.xlane.xlu1 %2772 }
 0x6cb   : > { %v3349_v54 = vpop.eup %3348 }
 0x6cc   : > { %2021 = vadd.xlane.f32.xlu0 %v2020_v1  ;;  %v2694_v4 = vpop.xlane.xlu1 %2693  ;;  %v3351_v7 = vpop.eup %3350  ;;  %v2780_v63 = vmul.f32 0.6931472, %v3349_v54 }
 0x6cd   : > { %v3353_v55 = vpop.eup %3352  ;;  %3358 = vlog2.f32 %v2694_v4  ;;  %v2778_v22 = vmul.f32 0.6931472, %v3351_v7 }
 0x6ce   : > { %3360 = vlog2.f32 %v2691_v31  ;;  %v2782_v39 = vmul.f32 0.6931472, %v3353_v55  ;;  %v2794_v58 = vsub.f32 %v4939_v5, %v2780_v63  ;;  %v3355_v53 = vpop.eup %3354 }
 0x6cf   : > { %v2793_v62 = vsub.f32 %v4898_v0, %v2778_v22  ;;  %v3357_v52 = vpop.eup %3356  ;;  %v2784_v35 = vmul.f32 0.6931472, %v3355_v53 }
 0x6d0   : > { %2226 = vadd.xlane.f32.xlu0 %v2225_v2  ;;  %v2697_v13 = vpop.xlane.xlu1 %2696  ;;  %v2795_v38 = vsub.f32 %v4903_v9, %v2782_v39  ;;  %v2803_v42 = vmul.f32 1.442695, %v2794_v58  ;;  %v2786_v28 = vmul.f32 0.6931472, %v3357_v52 }
 0x6d1   : > { %3362 = vlog2.f32 %v2697_v13  ;;  %v2801_v26 = vmul.f32 1.442695, %v2793_v62  ;;  %v2796_v44 = vsub.f32 %v4908_v30, %v2784_v35 }
 0x6d2   : > { %3364 = vlog2.f32 %v2770_v37  ;;  %v2805_v25 = vmul.f32 1.442695, %v2795_v38  ;;  %v2797_v34 = vsub.f32 %v4949_v27, %v2786_v28 }
 0x6d3   : > { %3366 = vlog2.f32 %v2773_v56  ;;  %v2807_v18 = vmul.f32 1.442695, %v2796_v44 }
 0x6d4   : > { %v2703_v48 = vpop.xlane.xlu1 %2702  ;;  %3368 = vlog2.f32 %v2700_v59  ;;  %v2809_v29 = vmul.f32 1.442695, %v2797_v34 }
 0x6d5   : > { %3370 = vlog2.f32 %v2703_v48 }
 0x6d6   : > { %3372 = vlog2.f32 %v2776_v36 }
 0x6d7   : > { %v3359_v60 = vpop.eup %3358  ;;  %3374 = vpow2.f32 %v2803_v42 }
 0x6d8   : > { %v3361_v8 = vpop.eup %3360  ;;  %v2716_v0 = vmul.f32 0.6931472, %v3359_v60  ;;  %3376 = vpow2.f32 %v2801_v26  ;;  %v2709_v47 = vpop.xlane.xlu1 %2708 }
 0x6d9   : > { %v2714_v9 = vmul.f32 0.6931472, %v3361_v8  ;;  %3378 = vpow2.f32 %v2805_v25 }
 0x6da   : > { %3380 = vlog2.f32 %v2706_v3  ;;  %v2730_v49 = vsub.f32 %v4963_v6, %v2716_v0 }
 0x6db   : > { %v3363_v5 = vpop.eup %3362  ;;  %v2729_v33 = vsub.f32 %v4918_v61, %v2714_v9  ;;  %3382 = vlog2.f32 %v2709_v47 }
 0x6dc   : > { %v3365_v10 = vpop.eup %3364  ;;  %v2718_v15 = vmul.f32 0.6931472, %v3363_v5  ;;  %v2818_v14 = vsub.f32 %v2794_v58, %v2730_v49  ;;  %3384 = vpow2.f32 %v2807_v18 }
 0x6dd   : > { %v3367_v32 = vpop.eup %3366  ;;  %v2788_v1 = vmul.f32 0.6931472, %v3365_v10  ;;  %v2817_v6 = vsub.f32 %v2793_v62, %v2729_v33  ;;  %3386 = vlog2.f32 %v2712_v51 }
 0x6de   : > { %v3369_v16 = vpop.eup %3368  ;;  %v2790_v23 = vmul.f32 0.6931472, %v3367_v32  ;;  %v2731_v30 = vsub.f32 %v4969_v41, %v2718_v15  ;;  %3388 = vpow2.f32 %v2809_v29 }
 0x6df   : > { %v3371_v2 = vpop.eup %3370  ;;  %v2720_v19 = vmul.f32 0.6931472, %v3369_v16  ;;  %v2798_v27 = vsub.f32 %v4913_v11, %v2788_v1 }
 0x6e0   : > { %v3373_v43 = vpop.eup %3372  ;;  %v2799_v56 = vsub.f32 %v4957_v20, %v2790_v23  ;;  %v2819_v31 = vsub.f32 %v2795_v38, %v2731_v30  ;;  %v2722_v61 = vmul.f32 0.6931472, %v3371_v2 }
 0x6e1   : > { %v3375_v37 = vpop.eup %3374  ;;  %v2792_v54 = vmul.f32 0.6931472, %v3373_v43  ;;  %v2732_v7 = vsub.f32 %v4929_v45, %v2720_v19  ;;  %v2811_v55 = vmul.f32 1.442695, %v2798_v27 }
 0x6e2   : > { %v3377_v4 = vpop.eup %3376  ;;  %v2826_v36 = vmul.f32 %v3375_v37, %v2818_v14  ;;  %v2813_v22 = vmul.f32 1.442695, %v2799_v56  ;;  %v2733_v11 = vsub.f32 %v4975_v46, %v2722_v61 }
 0x6e3   : > { %v3379_v41 = vpop.eup %3378  ;;  %v2825_v63 = vmul.f32 %v3377_v4, %v2817_v6  ;;  %v2800_v59 = vsub.f32 %v4922_v40, %v2792_v54  ;;  %v2820_v20 = vsub.f32 %v2796_v44, %v2732_v7  ;;  %3390 = vpow2.f32 %v2811_v55 }
 0x6e4   : > { %v3381_v13 = vpop.eup %3380  ;;  %v2827_v39 = vmul.f32 %v3379_v41, %v2819_v31  ;;  %v2834_v53 = vsel %vm1588_vm8, %v2826_v36, 0.0  ;;  %3392 = vpow2.f32 %v2813_v22  ;;  %v2821_v42 = vsub.f32 %v2797_v34, %v2733_v11  ;;  %v5235_v22 = vld [vmem:[#allocation20_spill] sm:$0xff] }
 0x6e5   : > { %v3383_v58 = vpop.eup %3382  ;;  %v2724_v62 = vmul.f32 0.6931472, %v3381_v13  ;;  %v2833_v38 = vsel %vm1588_vm8, %v2825_v63, 0.0  ;;  %v2815_v35 = vmul.f32 1.442695, %v2800_v59 }
 0x6e6   : > { %v2836_v45 = vsel %vm1588_vm8, %v2827_v39, 0.0  ;;  %v2726_v52 = vmul.f32 0.6931472, %v3383_v58  ;;  %v3385_v26 = vpop.eup %3384  ;;  %v2835_v46 = vadd.f32 %v2834_v53, %v2833_v38  ;;  %v2235_v39 = vmul.f32 %v5235_v22, %v5054_v17 }
 0x6e7   : > { %v3387_v8 = vpop.eup %3386  ;;  %v2828_v40 = vmul.f32 %v3385_v26, %v2820_v20  ;;  %v2734_v25 = vsub.f32 %v4935_v21, %v2724_v62 }
 0x6e8   : > { %v3389_v5 = vpop.eup %3388  ;;  %v2837_v28 = vadd.f32 %v2836_v45, %v2835_v46  ;;  %v2735_v44 = vsub.f32 %v4982_v50, %v2726_v52  ;;  %v2728_v47 = vmul.f32 0.6931472, %v3387_v8  ;;  %v2236_v38 = vsel %vm1861_vm0, %v2235_v39, 0.0 }
 0x6e9   : > { %v2829_v0 = vmul.f32 %v3389_v5, %v2821_v42  ;;  %v2838_v10 = vsel %vm1588_vm8, %v2828_v40, 0.0  ;;  %v2822_v15 = vsub.f32 %v2798_v27, %v2734_v25 }
 0x6ea   : > { %v2839_v34 = vadd.f32 %v2838_v10, %v2837_v28  ;;  %v2823_v49 = vsub.f32 %v2799_v56, %v2735_v44  ;;  %v2736_v2 = vsub.f32 %v4945_v24, %v2728_v47 }
 0x6eb   : > { %v2840_v21 = vsel %vm1588_vm8, %v2829_v0, 0.0 }
 0x6ec   : > { %v2841_v19 = vadd.f32 %v2840_v21, %v2839_v34  ;;  %v2824_v31 = vsub.f32 %v2800_v59, %v2736_v2 }
 0x6ed   : > { %v3391_v1 = vpop.eup %3390 }
 0x6ee   : > { %v3393_v50 = vpop.eup %3392  ;;  %v2830_v30 = vmul.f32 %v3391_v1, %v2822_v15 }
 0x6ef   : > { %v2831_v6 = vmul.f32 %v3393_v50, %v2823_v49 }
 0x6f0   : > { %v2842_v24 = vsel %vm1588_vm8, %v2830_v30, 0.0 }
 0x6f1   : > { %v2843_v36 = vadd.f32 %v2842_v24, %v2841_v19  ;;  %v2844_v11 = vsel %vm1588_vm8, %v2831_v6, 0.0 }
 0x6f3   : > { %v2845_v53 = vadd.f32 %v2844_v11, %v2843_v36 }
 0x720   : > { %v2582_v48 = vpop.permute.xlu0 %2581 }
 0x721   : > { %v2004_v60 = vpop.xlane.xlu1 %2003  ;;  %v2607_v16 = vrot.slane %v2582_v48, %v4103_v12 }
 0x722   : > { %3394 = vlog2.f32 %v2004_v60 }
 0x723   : > { %3396 = vpow2.f32 %v2815_v35 }
 0x724   : > { %v2591_v3 = vpop.permute.xlu0 %2590 }
 0x725   : > { %v2585_v9 = vpop.permute.xlu1 %2584  ;;  %v2619_v37 = vrot.slane %v2591_v3, %v4103_v12 }
 0x726   : > { %v2611_v32 = vrot.slane %v2585_v9, %v4103_v12 }
 0x728   : > { %v2597_v33 = vpop.permute.xlu0 %2596  ;;  %v2636_v29 = vsel %vm1125_vm1, %v2611_v32, %v2607_v16 }
 0x729   : > { %v2588_v18 = vpop.permute.xlu1 %2587  ;;  %v2627_v13 = vrot.slane %v2597_v33, %v4103_v12 }
 0x72a   : > { %v2615_v23 = vrot.slane %v2588_v18, %v4103_v12 }
 0x72c   : > { %v3395_v51 = vpop.eup %3394  ;;  %v2637_v43 = vsel %vm1127_vm2, %v2615_v23, %v2636_v29  ;;  %v2603_v41 = vpop.permute.xlu0 %2602 }
 0x72d   : > { %v2006_v14 = vmul.f32 0.6931472, %v3395_v51  ;;  %v2594_v27 = vpop.permute.xlu1 %2593  ;;  %v2638_v61 = vsel %vm1129_vm3, %v2619_v37, %v2637_v43  ;;  %v3397_v54 = vpop.eup %3396 }
 0x72e   : > { %v2623_v56 = vrot.slane %v2594_v27, %v4103_v12  ;;  %v2832_v20 = vmul.f32 %v3397_v54, %v2824_v31 }
 0x72f   : > { %v2007_v4 = vadd.f32 %v2006_v14, %v4838_v57  ;;  %v2635_v57 = vrot.slane %v2603_v41, %v4103_v12 }
 0x730   : > { %v2639_v7 = vsel %vm1131_vm4, %v2623_v56, %v2638_v61  ;;  %v2846_v45 = vsel %vm1588_vm8, %v2832_v20, 0.0 }
 0x731   : > { %v2600_v55 = vpop.permute.xlu1 %2599  ;;  %v2009_v63 = vsel %vm2008_vm10, %v2007_v4, 0.0  ;;  %v2640_v59 = vsel %vm1133_vm5, %v2627_v13, %v2639_v7  ;;  %v2847_v42 = vadd.f32 %v2846_v45, %v2845_v53 }
 0x732   : > { %v2631_v58 = vrot.slane %v2600_v55, %v4103_v12  ;;  %2010 = vadd.xlane.f32.xlu1 %v2009_v63 }
 0x734   : > { %v2641_v62 = vsel %vm1135_vm6, %v2631_v58, %v2640_v59 }
 0x735   : > { %v2642_v48 = vsel %vm1137_vm7, %v2635_v57, %v2641_v62 }
 0x736   : > { %2237 = vadd.xlane.f32.xlu1 %v2236_v38  ;;  %v2644_v17 = vsel %vm1861_vm0, %v2642_v48, 0.0 }
 0x737   : > { %2645 = vadd.xlane.f32.xlu0 %v2644_v17 }
 0x73a   : > { %2848 = vadd.xlane.f32.xlu1 %v2847_v42 }
 0x759   : > { %v2022_v52 = vpop.xlane.xlu0 %2021 }
 0x75a   : > { %v2023_v60 = vrot.slane %v2022_v52, 4 }
 0x75c   : > { %v2024_v35 = vadd.f32 %v2023_v60, %v2022_v52 }
 0x75d   : > { %v2227_v12 = vpop.xlane.xlu0 %2226 }
 0x75e   : > { %v2228_v26 = vrot.slane %v2227_v12, 4  ;;  %v2025_v8 = vrot.slane %v2024_v35, 2 }
 0x760   : > { %v2229_v46 = vadd.f32 %v2228_v26, %v2227_v12  ;;  %v2026_v0 = vadd.f32 %v2025_v8, %v2024_v35 }
 0x762   : > { %v2230_v25 = vrot.slane %v2229_v46, 2  ;;  %v2027_v18 = vrot.slane %v2026_v0, 1 }
 0x764   : > { %v2231_v15 = vadd.f32 %v2230_v25, %v2229_v46  ;;  %v2028_v43 = vadd.f32 %v2027_v18, %v2026_v0 }
 0x766   : > { %v2232_v23 = vrot.slane %v2231_v15, 1 }
 0x768   : > { %v2233_v14 = vadd.f32 %v2232_v23, %v2231_v15 }
 0x7bf   : > { %v2011_v40 = vpop.xlane.xlu1 %2010 }
 0x7c0   : > { %v2012_v5 = vrot.slane %v2011_v40, 4 }
 0x7c2   : > { %v2013_v28 = vadd.f32 %v2012_v5, %v2011_v40 }
 0x7c3   : > { %v2238_v3 = vpop.xlane.xlu1 %2237 }
 0x7c4   : > { %v2014_v44 = vrot.slane %v2013_v28, 2  ;;  %v2239_v9 = vrot.slane %v2238_v3, 4  ;;  %v2646_v10 = vpop.xlane.xlu0 %2645 }
 0x7c5   : > { %v2647_v47 = vrot.slane %v2646_v10, 4 }
 0x7c6   : > { %v2240_v32 = vadd.f32 %v2239_v9, %v2238_v3  ;;  %v2015_v34 = vadd.f32 %v2014_v44, %v2013_v28 }
 0x7c7   : > { %v2648_v49 = vadd.f32 %v2647_v47, %v2646_v10  ;;  %v2849_v16 = vpop.xlane.xlu1 %2848 }
 0x7c8   : > { %v2241_v21 = vrot.slane %v2240_v32, 2  ;;  %v2850_v1 = vrot.slane %v2849_v16, 4  ;;  %v2016_v33 = vrot.slane %v2015_v34, 1 }
 0x7c9   : > { %v2649_v50 = vrot.slane %v2648_v49, 2 }
 0x7ca   : > { %v2851_v30 = vadd.f32 %v2850_v1, %v2849_v16  ;;  %v2017_v2 = vadd.f32 %v2016_v33, %v2015_v34  ;;  %v2242_v29 = vadd.f32 %v2241_v21, %v2240_v32 }
 0x7cb   : > { %v2650_v51 = vadd.f32 %v2649_v50, %v2648_v49 }
 0x7cc   : > { %v2852_v19 = vrot.slane %v2851_v30, 2  ;;  %3176 = vpush %v2017_v2  ;;  %v2243_v37 = vrot.slane %v2242_v29, 1 }
 0x7cd   : > { %3178 = vpush %v2028_v43  ;;  %v2651_v27 = vrot.slane %v2650_v51, 1 }
 0x7ce   : > { %v2853_v6 = vadd.f32 %v2852_v19, %v2851_v30  ;;  %3180 = vpush %v2233_v14  ;;  %v2244_v56 = vadd.f32 %v2243_v37, %v2242_v29 }
 0x7cf   : > { %v2652_v31 = vadd.f32 %v2651_v27, %v2650_v51 }
 0x7d0   : > { %3182 = vpush %v2244_v56  ;;  %v2854_v61 = vrot.slane %v2853_v6, 1 }
 0x7d1   : > { %3184 = vpush %v2652_v31 }
 0x7d2   : > { %v2855_v4 = vadd.f32 %v2854_v61, %v2853_v6 }
 0x7d4   : > { %3186 = vpush %v2855_v4 }
 0x7fd   : > { %s3177_s20 = spop %3176 }
 0x7fe   : > { %s3179_s12 = spop %3178 }
 0x7ff   : > { %s3181_s30 = spop %3180  ;;  %s2030_s8 = ssub.f32 %s3177_s20, %s3179_s12 }
 0x800   : > { %s5112_s12 = scalar_lea.hbm %s5162_s6, %s3011_s0 }
 0x801   : > { %s3183_s18 = spop %3182 }
 0x802   : > { %s2246_s9 = ssub.f32 %s3181_s30, %s3183_s18  ;;  %s3185_s29 = spop %3184 }
 0x803   : > { %s2654_s17 = smul.f32 0.3, %s3185_s29  ;;  %s2863_s30 = scalar_lea.sflag [#allocation5], %s3738_s15 }
 0x804   : > { %s2247_s27 = sadd.f32 %s2246_s9, %s2030_s8  ;;  %s3458_s8 = scalar_lea.vmem %s5114_s3, 128 }
 0x805   : > { %s2655_s21 = smul.f32 0.0625, %s2654_s17  ;;  %s3187_s22 = spop %3186 }
 0x806   : > { %s2248_s19 = smul.f32 0.0625, %s2247_s27  ;;  %p3459_p1 = scmp.ne.s32.totalorder %s5114_s3, %s3458_s8 }
 0x807   : > { %s2857_s13 = smul.f32 0.1, %s3187_s22 }
 0x808   : > { %s2656_s16 = sadd.f32 %s2655_s21, %s2248_s19  ;;  %p3460_p10 = pnand %p3459_p1, %p5236_p12 }
 0x809   : > { %s2858_s1 = smul.f32 0.015625, %s2857_s13 }
 0x80a   : > { %p3461_p5 = pneg %p3460_p10 }
 0x80b   : > { %s2859_s5 = sadd.f32 %s2858_s1, %s2656_s16  ;;  %s3462_s1 = sshll.u32 %s3539_s4, 4  ;;  %s3463_s1 = int_to_ptr.vmem [resolvable:$false] %s3462_s1 }
 0x80c   : > { %s3464_s18 = scalar_lea.vmem %s3463_s1, 256  ;;  %p3465_p7 = scmp.lt.s32.totalorder %s5114_s3, %s3463_s1 }
 0x80d   : > { %v2860_v24 = vstv %s2859_s5  ;;  %p3466_p9 = scmp.lt.s32.totalorder %s3464_s18, %s3458_s8 }
 0x80e   : > { %2861 = vst [vmem:[%s338_s2] sm:$0xff] %v2860_v24 }
 0x80f   : > { %p3467_p11 = por %p3466_p9, %p3465_p7 }
 0x811   : > { %p3468_p3 = pnand %p3467_p11, %p3461_p5 }
 0x813   : > { %3471 = shalt.err (!%p3468_p3)
}
 0x814   : > { %s3472_s0 = scalar_lea.hbm %s5112_s12, 128  ;;  %s3476_s7 = scalar_lea.hbm %s5162_s6, 256 }
 0x815   : > { %p3473_p8 = scmp.ne.s32.totalorder %s5112_s12, %s3472_s0  ;;  %p3477_p4 = scmp.lt.u32.totalorder %s5112_s12, %s5162_s6 }
 0x816   : > { %p3478_p6 = scmp.lt.u32.totalorder %s3476_s7, %s3472_s0  ;;  %p3480_p1 = scmp.lt.u32.totalorder %s3472_s0, %s5112_s12 }
 0x817   : > { %p3474_p0 = pnand %p3473_p8, %p5236_p12 }
 0x818   : > { %p3479_p13 = por %p3478_p6, %p3477_p4 }
 0x819   : > { %p3475_p2 = pneg %p3474_p0 }
 0x81a   : > { %p3481_p10 = por %p3480_p1, %p3479_p13 }
 0x81c   : > { %p3482_p5 = pnand %p3481_p10, %p3475_p2 }
 0x81e   : > { %3485 = shalt.err (!%p3482_p5)
}
 0x81f   : > { %3192 = dma.vmem_to_hbm [thread:$0]  (%p5236_p12), %s5114_s3, 128, %s5112_s12, %s2863_s30  }
 0x820 PF: > { %s2888_s29 = sand.u32 1, %s3516_s23   ;;  %p5237_p7 = scmp.ne.s32.totalorder %s5193_s11, 0 }
 0x821   : > { %p5238_p9 = scmp.ge.s32.totalorder %s3528_s26, 2  ;;  %s2889_s17 = scalar_lea.sflag [#allocation5], %s2888_s29 }
 0x823   : > { %p3202_p11 = pnand %p5238_p9, %p5237_p7 }
 0x825   : > { %3511 = dma.done.wait (!%p3202_p11), %s2889_s17, 128  }
 0x826   : > { %3513 = vsyncadd (!%p3202_p11), %s2889_s17, 4294967168  ;;  %s5239_s14 = sld [smem:[#allocation12_spill]]  ;;  %p23_p3 = scmp.ge.s32.totalorder %s3603_s28, 4  }
 0x827   : > { %s5240_s23 = smov %s3520_s24  ;;  %s5241_s24 = smov %s3524_s25 }
 0x828   : > { %s5243_s26 = smov %s3603_s28  ;;  %25 = sbr.rel (!%p23_p3) target bundleno = 14 (0xe), region = 108 }
 0x82c   : > { %s5242_s25 = smov %s5239_s14 }
 0x82f   :  { %2894 = vsyncpa [#allocation4], 1 }
 0x830   :  { %2896 = vsyncpa [#allocation4 + $0x1], 1 }
 0x831   :  { %2897 = vsyncpa [#allocation7], 1 }
 0x832   :  { %2899 = vsyncpa [#allocation7 + $0x1], 1 }
 0x833   :  { %2900 = vsyncpa [#allocation5], 1 }
 0x834   :  { %2902 = vsyncpa [#allocation5 + $0x1], 1 }

</bundles_post_ra>
